<compile_context>
chip_gen: v6e
topology: v6e:2x2x1
jax: 0.10.0
libtpu: 0.0.40
codegen_flags: <defaults>
</compile_context>

<pallas_src>
import numpy as np

import jax
import jax.numpy as jnp
from jax.experimental import pallas as pl
from jax.experimental.pallas import tpu as pltpu


# ------------------------------------------------------------------ helpers

def _round_up(x, m):
    return (x + m - 1) // m * m


def _vmem_capacity_bytes():
    """Physical VMEM per TensorCore (generation-gated), conservative default."""
    try:
        cap = getattr(pltpu.get_tpu_info(), "vmem_capacity_bytes", None)
        if cap:
            return int(cap)
    except Exception:
        pass
    return 64 * 1024 * 1024          # v7x floor; v5e / v6e have 128 MiB


def _pick_tiles(n):
    """Square (tm, tk) tiles; bigger for bigger graphs.  Keeps >= 2 row blocks
    whenever possible so the 'parallel' axis can shard across v7x's 2 TCs."""
    if n >= 4096:
        return 512, 512
    if n >= 1024:
        return 256, 256
    return 128, 128


# ----------------------------------------------------- host-side preprocessing

def preprocess_adjacency(norm_adj, tm, tk):
    """Pad the normalized adjacency and extract its block-sparsity pattern.

    Returns:
      a_pad  : (n_pad, n_pad) bfloat16 device array (only nonzero tiles DMA'd)
      counts : (nbr,)         int32   #nonzero column blocks per row block
      cols   : (nbr * max_c,) int32   column-block ids, tail-padded with the
                                      last valid id (reuse tile -> no extra DMA)
      n_pad, max_c
    """
    a = np.asarray(norm_adj, dtype=np.float32)
    n = a.shape[0]
    step = int(np.lcm(tm, tk))
    n_pad = _round_up(max(n, step), step)

    a_pad = np.zeros((n_pad, n_pad), np.float32)
    a_pad[:n, :n] = a

    nbr, nbc = n_pad // tm, n_pad // tk
    tiles = a_pad.reshape(nbr, tm, nbc, tk)
    nonzero = np.abs(tiles).sum(axis=(1, 3)) > 0.0            # (nbr, nbc)

    counts = nonzero.sum(axis=1).astype(np.int32)             # (nbr,)
    max_c = max(int(counts.max()), 1)
    cols = np.zeros((nbr, max_c), np.int32)
    for i in range(nbr):
        idx = np.flatnonzero(nonzero[i]).astype(np.int32)
        if idx.size:
            cols[i, :idx.size] = idx
            cols[i, idx.size:] = idx[-1]    # repeat last -> same block, no DMA

    return (jnp.asarray(a_pad, dtype=jnp.bfloat16),
            jnp.asarray(counts),
            jnp.asarray(cols.reshape(-1)),
            n_pad, max_c)


# ------------------------------------------------------------------ kernel

def _make_layer_fn(n_pad, d, tm, tk, max_c, inv_layers, e_resident, vmem_limit):
    """One fused LightGCN layer:  ego_new = A @ ego ;  sum += ego_new / L."""
    nbr = n_pad // tm

    def kernel(counts_ref, cols_ref, a_ref, e_ref, sum_in_ref,
               ego_out_ref, sum_out_ref, acc_ref):
        i = pl.program_id(0)
        k = pl.program_id(1)

        @pl.when(k == 0)
        def _():
            acc_ref[...] = jnp.zeros_like(acc_ref)

        # Only real (nonzero) column blocks contribute; padded tail steps of a
        # short row reuse the resident tile and skip the MXU op.
        @pl.when(k < counts_ref[i])
        def _():
            if e_resident:
                col = cols_ref[i * max_c + k]
                start = pl.multiple_of(col * tk, tk)
                e_tile = e_ref[pl.ds(start, tk), :]
            else:
                e_tile = e_ref[...]
            acc_ref[...] += jnp.dot(a_ref[...], e_tile,
                                    preferred_element_type=jnp.float32)

        @pl.when(k == max_c - 1)
        def _():
            acc = acc_ref[...]
            ego_out_ref[...] = acc.astype(ego_out_ref.dtype)
            # 1/n_layers folded in -> the running sum is already the layer mean.
            sum_out_ref[...] = sum_in_ref[...] + acc * inv_layers

    a_spec = pl.BlockSpec((tm, tk),
                          lambda i, k, counts, cols: (i, cols[i * max_c + k]))
    if e_resident:
        # Whole E matrix resident in VMEM (constant block index -> one DMA).
        e_spec = pl.BlockSpec((n_pad, d), lambda i, k, counts, cols: (0, 0))
    else:
        e_spec = pl.BlockSpec((tk, d),
                              lambda i, k, counts, cols: (cols[i * max_c + k], 0))
    row_spec = pl.BlockSpec((tm, d), lambda i, k, counts, cols: (i, 0))

    return pl.pallas_call(
        kernel,
        out_shape=(jax.ShapeDtypeStruct((n_pad, d), jnp.bfloat16),   # new ego
                   jax.ShapeDtypeStruct((n_pad, d), jnp.float32)),   # new sum
        grid_spec=pltpu.PrefetchScalarGridSpec(
            num_scalar_prefetch=2,
            grid=(nbr, max_c),
            in_specs=[a_spec, e_spec, row_spec],
            out_specs=(row_spec, row_spec),
            scratch_shapes=[pltpu.VMEM((tm, d), jnp.float32)],
        ),
        compiler_params=pltpu.CompilerParams(
            dimension_semantics=("parallel", "arbitrary"),
            vmem_limit_bytes=vmem_limit),
    )


# -------------------------------------------------------------- LightGCN fwd

def lightgcn_forward(norm_adj, user_emb, item_emb, n_layers):
    """Exact semantics of LightGCN.forward(perturbed=False)."""
    user_num = int(user_emb.shape[0])
    item_num = int(item_emb.shape[0])
    d = int(user_emb.shape[1])
    n = user_num + item_num
    assert norm_adj.shape == (n, n)

    tm, tk = _pick_tiles(n)
    a_pad, counts, cols, n_pad, max_c = preprocess_adjacency(norm_adj, tm, tk)

    # VMEM plan: double-buffered A / sum / ego tiles + f32 accumulator, plus E
    # either fully resident or streamed per (tk, D) tile.  Generation-gated.
    budget = int(_vmem_capacity_bytes() * 0.65)
    base = (2 * tm * tk * 2          # A tile (bf16) x 2 buffers
            + 2 * tm * d * 4         # sum_in (f32)
            + 2 * tm * d * 2         # ego_out (bf16)
            + 2 * tm * d * 4         # sum_out (f32)
            + tm * d * 4)            # acc scratch
    e_res_bytes = 2 * n_pad * d * 2
    e_resident = (base + e_res_bytes) <= budget
    need = base + (e_res_bytes if e_resident else 2 * tk * d * 2)
    vmem_limit = int(min(budget, max(32 * 1024 * 1024, need + 4 * 1024 * 1024)))

    layer_fn = _make_layer_fn(n_pad, d, tm, tk, max_c,
                              inv_layers=1.0 / n_layers,
                              e_resident=e_resident,
                              vmem_limit=vmem_limit)

    @jax.jit
    def run(counts, cols, a, u, it):
        ego = jnp.concatenate([u, it], axis=0)                    # (N, D) f32
        ego = jnp.pad(ego, ((0, n_pad - n), (0, 0))).astype(jnp.bfloat16)
        mean = jnp.zeros((n_pad, d), jnp.float32)
        for _ in range(n_layers):
            ego, mean = layer_fn(counts, cols, a, ego, mean)
        return mean[:n]                                           # already / L

    out = run(counts, cols, a_pad, user_emb, item_emb)
    return out[:user_num], out[user_num:]


# ----------------------------------------------------------------- utilities

def xavier_uniform(key, shape, dtype=jnp.float32):
    fan_in, fan_out = shape
    bound = (6.0 / (fan_in + fan_out)) ** 0.5
    return jax.random.uniform(key, shape, dtype, minval=-bound, maxval=bound)


def build_norm_adj(key, user_num, item_num, density=0.05, dtype=jnp.float32):
    """Symmetric-normalized bipartite adjacency D^-1/2 A D^-1/2 (dense demo)."""
    n = user_num + item_num
    r = (jax.random.uniform(key, (user_num, item_num)) < density).astype(dtype)
    a = jnp.zeros((n, n), dtype)
    a = a.at[:user_num, user_num:].set(r)
    a = a.at[user_num:, :user_num].set(r.T)
    deg = jnp.sum(a, axis=1)
    d_inv_sqrt = jnp.where(deg > 0, 1.0 / jnp.sqrt(deg), 0.0)
    return a * d_inv_sqrt[:, None] * d_inv_sqrt[None, :]


# --------------------------------------------------------------------- main

if __name__ == "__main__":
    user_num, item_num = 100, 150      # N = 250 -> padded to 256, 2 row blocks
    emb_size = 128
    n_layers = 3

    key = jax.random.PRNGKey(0)
    k_adj, k_user, k_item = jax.random.split(key, 3)

    norm_adj = build_norm_adj(k_adj, user_num, item_num)
    user_emb = xavier_uniform(k_user, (user_num, emb_size))
    item_emb = xavier_uniform(k_item, (item_num, emb_size))

    user_out, item_out = lightgcn_forward(norm_adj, user_emb, item_emb, n_layers)
    jax.block_until_ready((user_out, item_out))

    # reference check in plain float32 JAX (kernel streams bf16 -> relaxed tol)
    ego = jnp.concatenate([user_emb, item_emb], axis=0)
    outs = []
    for _ in range(n_layers):
        ego = norm_adj @ ego
        outs.append(ego)
    ref = jnp.mean(jnp.stack(outs, axis=0), axis=0)

    assert user_out.shape == (user_num, emb_size)
    assert item_out.shape == (item_num, emb_size)
    assert jnp.allclose(user_out, ref[:user_num], atol=1e-2, rtol=5e-2)
    assert jnp.allclose(item_out, ref[user_num:], atol=1e-2, rtol=5e-2)

    print("KERNEL_OK")
</pallas_src>

<mosaic_0001>
module attributes {stable_mosaic.version = 11 : i64} {
  func.func @kernel(%arg0: i32, %arg1: i32, %arg2: memref<2xi32, #tpu.memory_space<smem>>, %arg3: memref<4xi32, #tpu.memory_space<smem>>, %arg4: memref<128x128xbf16, #tpu.memory_space<vmem>>, %arg5: memref<256x128xbf16, #tpu.memory_space<vmem>>, %arg6: memref<128x128xf32, #tpu.memory_space<vmem>>, %arg7: memref<128x128xbf16, #tpu.memory_space<vmem>>, %arg8: memref<128x128xf32, #tpu.memory_space<vmem>>, %arg9: memref<128x128xf32, #tpu.memory_space<vmem>>) attributes {dimension_semantics = [#tpu.dimension_semantics<parallel>, #tpu.dimension_semantics<arbitrary>], iteration_bounds = array<i64: 2, 2>, scalar_prefetch = 2 : i64, scratch_operands = 1 : i64, tpu.core_type = #tpu.core_type<tc>, window_params = [{transform_indices = @transform_0, window_bounds = array<i64: 128, 128>}, {pipeline_mode = #tpu.pipeline_mode<synchronous>, transform_indices = @transform_1, window_bounds = array<i64: 256, 128>}, {transform_indices = @transform_2, window_bounds = array<i64: 128, 128>}, {transform_indices = @transform_3, window_bounds = array<i64: 128, 128>}, {transform_indices = @transform_4, window_bounds = array<i64: 128, 128>}]} {
    %c0_i32 = arith.constant 0 : i32
    %0 = arith.cmpi eq, %arg1, %c0_i32 : i32
    %1 = arith.extui %0 : i1 to i32
    %c0_i32_0 = arith.constant 0 : i32
    %2 = arith.cmpi ne, %1, %c0_i32_0 : i32
    scf.if %2 {
      %cst = arith.constant 0.000000e+00 : f32
      %11 = vector.broadcast %cst : f32 to vector<128x128xf32>
      %c0 = arith.constant 0 : index
      %c0_3 = arith.constant 0 : index
      %12 = vector.load %arg9[%c0, %c0_3] : memref<128x128xf32, #tpu.memory_space<vmem>>, vector<128x128xf32>
      tpu.vector_store %arg9[%c0, %c0_3], %11 {strides = array<i32>} : memref<128x128xf32, #tpu.memory_space<vmem>>, vector<128x128xf32>,
    } else {
    }
    %3 = arith.index_cast %arg0 : i32 to index
    %4 = memref.load %arg2[%3] : memref<2xi32, #tpu.memory_space<smem>>
    %5 = arith.cmpi slt, %arg1, %4 : i32
    %6 = arith.extui %5 : i1 to i32
    %c0_i32_1 = arith.constant 0 : i32
    %7 = arith.cmpi ne, %6, %c0_i32_1 : i32
    scf.if %7 {
      %c2_i32 = arith.constant 2 : i32
      %11 = arith.muli %arg0, %c2_i32 : i32
      %12 = arith.addi %11, %arg1 : i32
      %13 = arith.index_cast %12 : i32 to index
      %14 = memref.load %arg3[%13] : memref<4xi32, #tpu.memory_space<smem>>
      %c128_i32 = arith.constant 128 : i32
      %15 = arith.muli %14, %c128_i32 : i32
      %16 = tpu.assume_multiple %15, 128 : i32
      %17 = arith.index_cast %16 : i32 to index
      %c0 = arith.constant 0 : index
      %18 = vector.load %arg5[%17, %c0] : memref<256x128xbf16, #tpu.memory_space<vmem>>, vector<128x128xbf16>
      %c0_3 = arith.constant 0 : index
      %c0_4 = arith.constant 0 : index
      %19 = vector.load %arg9[%c0_3, %c0_4] : memref<128x128xf32, #tpu.memory_space<vmem>>, vector<128x128xf32>
      %c0_5 = arith.constant 0 : index
      %c0_6 = arith.constant 0 : index
      %20 = vector.load %arg4[%c0_5, %c0_6] : memref<128x128xbf16, #tpu.memory_space<vmem>>, vector<128x128xbf16>
      %cst = arith.constant dense<0.000000e+00> : vector<128x128xf32>
      %21 = tpu.matmul %20, %18, %cst {dimension_numbers = #tpu.dot_dimension_numbers<[1], [0], [0], [1], [0, 0, 1, 1], [], []>} : vector<128x128xbf16>, vector<128x128xbf16>, vector<128x128xf32> -> vector<128x128xf32>
      %22 = arith.addf %19, %21 : vector<128x128xf32>
      %c0_7 = arith.constant 0 : index
      %c0_8 = arith.constant 0 : index
      %23 = vector.load %arg9[%c0_7, %c0_8] : memref<128x128xf32, #tpu.memory_space<vmem>>, vector<128x128xf32>
      tpu.vector_store %arg9[%c0_7, %c0_8], %22 {strides = array<i32>} : memref<128x128xf32, #tpu.memory_space<vmem>>, vector<128x128xf32>,
    } else {
    }
    %c1_i32 = arith.constant 1 : i32
    %8 = arith.cmpi eq, %arg1, %c1_i32 : i32
    %9 = arith.extui %8 : i1 to i32
    %c0_i32_2 = arith.constant 0 : i32
    %10 = arith.cmpi ne, %9, %c0_i32_2 : i32
    scf.if %10 {
      %c0 = arith.constant 0 : index
      %c0_3 = arith.constant 0 : index
      %11 = vector.load %arg9[%c0, %c0_3] : memref<128x128xf32, #tpu.memory_space<vmem>>, vector<128x128xf32>
      %12 = arith.truncf %11 : vector<128x128xf32> to vector<128x128xbf16>
      %c0_4 = arith.constant 0 : index
      %c0_5 = arith.constant 0 : index
      %13 = vector.load %arg7[%c0_4, %c0_5] : memref<128x128xbf16, #tpu.memory_space<vmem>>, vector<128x128xbf16>
      tpu.vector_store %arg7[%c0_4, %c0_5], %12 {strides = array<i32>} : memref<128x128xbf16, #tpu.memory_space<vmem>>, vector<128x128xbf16>,
      %c0_6 = arith.constant 0 : index
      %c0_7 = arith.constant 0 : index
      %14 = vector.load %arg6[%c0_6, %c0_7] : memref<128x128xf32, #tpu.memory_space<vmem>>, vector<128x128xf32>
      %cst = arith.constant 0.333333343 : f32
      %15 = vector.broadcast %cst : f32 to vector<128x128xf32>
      %16 = arith.mulf %11, %15 : vector<128x128xf32>
      %17 = arith.addf %14, %16 : vector<128x128xf32>
      %c0_8 = arith.constant 0 : index
      %c0_9 = arith.constant 0 : index
      %18 = vector.load %arg8[%c0_8, %c0_9] : memref<128x128xf32, #tpu.memory_space<vmem>>, vector<128x128xf32>
      tpu.vector_store %arg8[%c0_8, %c0_9], %17 {strides = array<i32>} : memref<128x128xf32, #tpu.memory_space<vmem>>, vector<128x128xf32>,
    } else {
    }
    return
  }
  func.func @transform_0(%arg0: i32, %arg1: i32, %arg2: memref<2xi32, #tpu.memory_space<smem>>, %arg3: memref<4xi32, #tpu.memory_space<smem>>) -> (i32, i32) {
    %c2_i32 = arith.constant 2 : i32
    %0 = arith.muli %arg0, %c2_i32 : i32
    %1 = arith.addi %0, %arg1 : i32
    %2 = arith.index_cast %1 : i32 to index
    %3 = memref.load %arg3[%2] : memref<4xi32, #tpu.memory_space<smem>>
    %c0_i32 = arith.constant 0 : i32
    return %arg0, %3 : i32, i32
  }
  func.func @transform_1(%arg0: i32, %arg1: i32, %arg2: memref<2xi32, #tpu.memory_space<smem>>, %arg3: memref<4xi32, #tpu.memory_space<smem>>) -> (i32, i32) {
    %c0_i32 = arith.constant 0 : i32
    %c0_i32_0 = arith.constant 0 : i32
    %c0_i32_1 = arith.constant 0 : i32
    return %c0_i32, %c0_i32_0 : i32, i32
  }
  func.func @transform_2(%arg0: i32, %arg1: i32, %arg2: memref<2xi32, #tpu.memory_space<smem>>, %arg3: memref<4xi32, #tpu.memory_space<smem>>) -> (i32, i32) {
    %c0_i32 = arith.constant 0 : i32
    %c0_i32_0 = arith.constant 0 : i32
    return %arg0, %c0_i32 : i32, i32
  }
  func.func @transform_3(%arg0: i32, %arg1: i32, %arg2: memref<2xi32, #tpu.memory_space<smem>>, %arg3: memref<4xi32, #tpu.memory_space<smem>>) -> (i32, i32) {
    %c0_i32 = arith.constant 0 : i32
    %c0_i32_0 = arith.constant 0 : i32
    return %arg0, %c0_i32 : i32, i32
  }
  func.func @transform_4(%arg0: i32, %arg1: i32, %arg2: memref<2xi32, #tpu.memory_space<smem>>, %arg3: memref<4xi32, #tpu.memory_space<smem>>) -> (i32, i32) {
    %c0_i32 = arith.constant 0 : i32
    %c0_i32_0 = arith.constant 0 : i32
    return %arg0, %c0_i32 : i32, i32
  }
}

module attributes {stable_mosaic.version = 11 : i64} {
  func.func @kernel(%arg0: i32, %arg1: i32, %arg2: memref<2xi32, #tpu.memory_space<smem>>, %arg3: memref<4xi32, #tpu.memory_space<smem>>, %arg4: memref<128x128xbf16, #tpu.memory_space<vmem>>, %arg5: memref<256x128xbf16, #tpu.memory_space<vmem>>, %arg6: memref<128x128xf32, #tpu.memory_space<vmem>>, %arg7: memref<128x128xbf16, #tpu.memory_space<vmem>>, %arg8: memref<128x128xf32, #tpu.memory_space<vmem>>, %arg9: memref<128x128xf32, #tpu.memory_space<vmem>>) attributes {dimension_semantics = [#tpu.dimension_semantics<parallel>, #tpu.dimension_semantics<arbitrary>], iteration_bounds = array<i64: 2, 2>, scalar_prefetch = 2 : i64, scratch_operands = 1 : i64, tpu.core_type = #tpu.core_type<tc>, window_params = [{transform_indices = @transform_0, window_bounds = array<i64: 128, 128>}, {pipeline_mode = #tpu.pipeline_mode<synchronous>, transform_indices = @transform_1, window_bounds = array<i64: 256, 128>}, {transform_indices = @transform_2, window_bounds = array<i64: 128, 128>}, {transform_indices = @transform_3, window_bounds = array<i64: 128, 128>}, {transform_indices = @transform_4, window_bounds = array<i64: 128, 128>}]} {
    %c0_i32 = arith.constant 0 : i32
    %0 = arith.cmpi eq, %arg1, %c0_i32 : i32
    %1 = arith.extui %0 : i1 to i32
    %c0_i32_0 = arith.constant 0 : i32
    %2 = arith.cmpi ne, %1, %c0_i32_0 : i32
    scf.if %2 {
      %cst = arith.constant 0.000000e+00 : f32
      %11 = vector.broadcast %cst : f32 to vector<128x128xf32>
      %c0 = arith.constant 0 : index
      %c0_3 = arith.constant 0 : index
      %12 = vector.load %arg9[%c0, %c0_3] : memref<128x128xf32, #tpu.memory_space<vmem>>, vector<128x128xf32>
      tpu.vector_store %arg9[%c0, %c0_3], %11 {strides = array<i32>} : memref<128x128xf32, #tpu.memory_space<vmem>>, vector<128x128xf32>,
    } else {
    }
    %3 = arith.index_cast %arg0 : i32 to index
    %4 = memref.load %arg2[%3] : memref<2xi32, #tpu.memory_space<smem>>
    %5 = arith.cmpi slt, %arg1, %4 : i32
    %6 = arith.extui %5 : i1 to i32
    %c0_i32_1 = arith.constant 0 : i32
    %7 = arith.cmpi ne, %6, %c0_i32_1 : i32
    scf.if %7 {
      %c2_i32 = arith.constant 2 : i32
      %11 = arith.muli %arg0, %c2_i32 : i32
      %12 = arith.addi %11, %arg1 : i32
      %13 = arith.index_cast %12 : i32 to index
      %14 = memref.load %arg3[%13] : memref<4xi32, #tpu.memory_space<smem>>
      %c128_i32 = arith.constant 128 : i32
      %15 = arith.muli %14, %c128_i32 : i32
      %16 = tpu.assume_multiple %15, 128 : i32
      %17 = arith.index_cast %16 : i32 to index
      %c0 = arith.constant 0 : index
      %18 = vector.load %arg5[%17, %c0] : memref<256x128xbf16, #tpu.memory_space<vmem>>, vector<128x128xbf16>
      %c0_3 = arith.constant 0 : index
      %c0_4 = arith.constant 0 : index
      %19 = vector.load %arg9[%c0_3, %c0_4] : memref<128x128xf32, #tpu.memory_space<vmem>>, vector<128x128xf32>
      %c0_5 = arith.constant 0 : index
      %c0_6 = arith.constant 0 : index
      %20 = vector.load %arg4[%c0_5, %c0_6] : memref<128x128xbf16, #tpu.memory_space<vmem>>, vector<128x128xbf16>
      %cst = arith.constant dense<0.000000e+00> : vector<128x128xf32>
      %21 = tpu.matmul %20, %18, %cst {dimension_numbers = #tpu.dot_dimension_numbers<[1], [0], [0], [1], [0, 0, 1, 1], [], []>} : vector<128x128xbf16>, vector<128x128xbf16>, vector<128x128xf32> -> vector<128x128xf32>
      %22 = arith.addf %19, %21 : vector<128x128xf32>
      %c0_7 = arith.constant 0 : index
      %c0_8 = arith.constant 0 : index
      %23 = vector.load %arg9[%c0_7, %c0_8] : memref<128x128xf32, #tpu.memory_space<vmem>>, vector<128x128xf32>
      tpu.vector_store %arg9[%c0_7, %c0_8], %22 {strides = array<i32>} : memref<128x128xf32, #tpu.memory_space<vmem>>, vector<128x128xf32>,
    } else {
    }
    %c1_i32 = arith.constant 1 : i32
    %8 = arith.cmpi eq, %arg1, %c1_i32 : i32
    %9 = arith.extui %8 : i1 to i32
    %c0_i32_2 = arith.constant 0 : i32
    %10 = arith.cmpi ne, %9, %c0_i32_2 : i32
    scf.if %10 {
      %c0 = arith.constant 0 : index
      %c0_3 = arith.constant 0 : index
      %11 = vector.load %arg9[%c0, %c0_3] : memref<128x128xf32, #tpu.memory_space<vmem>>, vector<128x128xf32>
      %12 = arith.truncf %11 : vector<128x128xf32> to vector<128x128xbf16>
      %c0_4 = arith.constant 0 : index
      %c0_5 = arith.constant 0 : index
      %13 = vector.load %arg7[%c0_4, %c0_5] : memref<128x128xbf16, #tpu.memory_space<vmem>>, vector<128x128xbf16>
      tpu.vector_store %arg7[%c0_4, %c0_5], %12 {strides = array<i32>} : memref<128x128xbf16, #tpu.memory_space<vmem>>, vector<128x128xbf16>,
      %c0_6 = arith.constant 0 : index
      %c0_7 = arith.constant 0 : index
      %14 = vector.load %arg6[%c0_6, %c0_7] : memref<128x128xf32, #tpu.memory_space<vmem>>, vector<128x128xf32>
      %cst = arith.constant 0.333333343 : f32
      %15 = vector.broadcast %cst : f32 to vector<128x128xf32>
      %16 = arith.mulf %11, %15 : vector<128x128xf32>
      %17 = arith.addf %14, %16 : vector<128x128xf32>
      %c0_8 = arith.constant 0 : index
      %c0_9 = arith.constant 0 : index
      %18 = vector.load %arg8[%c0_8, %c0_9] : memref<128x128xf32, #tpu.memory_space<vmem>>, vector<128x128xf32>
      tpu.vector_store %arg8[%c0_8, %c0_9], %17 {strides = array<i32>} : memref<128x128xf32, #tpu.memory_space<vmem>>, vector<128x128xf32>,
    } else {
    }
    return
  }
  func.func @transform_0(%arg0: i32, %arg1: i32, %arg2: memref<2xi32, #tpu.memory_space<smem>>, %arg3: memref<4xi32, #tpu.memory_space<smem>>) -> (i32, i32) {
    %c2_i32 = arith.constant 2 : i32
    %0 = arith.muli %arg0, %c2_i32 : i32
    %1 = arith.addi %0, %arg1 : i32
    %2 = arith.index_cast %1 : i32 to index
    %3 = memref.load %arg3[%2] : memref<4xi32, #tpu.memory_space<smem>>
    %c0_i32 = arith.constant 0 : i32
    return %arg0, %3 : i32, i32
  }
  func.func @transform_1(%arg0: i32, %arg1: i32, %arg2: memref<2xi32, #tpu.memory_space<smem>>, %arg3: memref<4xi32, #tpu.memory_space<smem>>) -> (i32, i32) {
    %c0_i32 = arith.constant 0 : i32
    %c0_i32_0 = arith.constant 0 : i32
    %c0_i32_1 = arith.constant 0 : i32
    return %c0_i32, %c0_i32_0 : i32, i32
  }
  func.func @transform_2(%arg0: i32, %arg1: i32, %arg2: memref<2xi32, #tpu.memory_space<smem>>, %arg3: memref<4xi32, #tpu.memory_space<smem>>) -> (i32, i32) {
    %c0_i32 = arith.constant 0 : i32
    %c0_i32_0 = arith.constant 0 : i32
    return %arg0, %c0_i32 : i32, i32
  }
  func.func @transform_3(%arg0: i32, %arg1: i32, %arg2: memref<2xi32, #tpu.memory_space<smem>>, %arg3: memref<4xi32, #tpu.memory_space<smem>>) -> (i32, i32) {
    %c0_i32 = arith.constant 0 : i32
    %c0_i32_0 = arith.constant 0 : i32
    return %arg0, %c0_i32 : i32, i32
  }
  func.func @transform_4(%arg0: i32, %arg1: i32, %arg2: memref<2xi32, #tpu.memory_space<smem>>, %arg3: memref<4xi32, #tpu.memory_space<smem>>) -> (i32, i32) {
    %c0_i32 = arith.constant 0 : i32
    %c0_i32_0 = arith.constant 0 : i32
    return %arg0, %c0_i32 : i32, i32
  }
}

</mosaic_0001>

<bundles_post_ra>
// kernel: run.5
= control target key start
LH: loop header
LB: loop body
LE: loop exit
PB: predicated region body
PF: predicated region fallthrough
CT: control target
= control target key end

     0   :  { %s1836_s0 = inlined_call_operand.vmem [shape: s32[2], index: 0, kind: input, shape index: {}]   ;;  %s1837_s2 = inlined_call_operand.vmem [shape: bf16[256,256], index: 2, kind: input, shape index: {}]   ;;  %s1838_s3 = inlined_call_operand.vmem [shape: bf16[256,128], index: 3, kind: input, shape index: {}]   ;;  %s1839_s4 = inlined_call_operand.vmem [shape: f32[256,128], index: 4, kind: input, shape index: {}]   ;;  %s1840_s5 = inlined_call_operand.hbm [shape: bf16[256,128], index: 5, kind: output, shape index: {0}]   ;;  %s1841_s6 = inlined_call_operand.hbm [shape: f32[256,128], index: 6, kind: output, shape index: {1}]   ;;  %s1842_s1 = inlined_call_operand.vmem [shape: s32[4], index: 1, kind: input, shape index: {}]  }
   0x1   :  { %s12_s23 = sshll.u32 %s1836_s0, 4  ;;  %s16_s26 = sshll.u32 %s1842_s1, 4  ;;  %s13_s23 = int_to_ptr.vmem [resolvable:$true] %s12_s23  ;;  %s17_s26 = int_to_ptr.vmem [resolvable:$true] %s16_s26 }
   0x2   :  { %s1317_s27 = scalar_lea.vmem %s13_s23, 16  ;;  %p1322_p1 = scmp.lt.s32.totalorder %s13_s23, %s13_s23 }
   0x3   :  { %p1318_p0 = scmp.ne.s32.totalorder %s13_s23, %s1317_s27  ;;  %p1323_p2 = scmp.lt.s32.totalorder %s1317_s27, %s1317_s27 }
   0x5   :  { %p1324_p3 = por %p1323_p2, %p1322_p1 }
   0x7   :  { %p1325_p4 = pnand %p1324_p3, %p1318_p0 }
   0x9   :  { %1328 = shalt.err (!%p1325_p4)  }
   0xa   :  { %s1483_s28 = smov [#allocation4]   ;;  %s1329_s29 = scalar_lea.vmem %s17_s26, 16 }
   0xb   :  { %15 = dma.vmem_to_smem %s13_s23, 16, %s1483_s28, [#allocation3] }
   0xc   :  { %p1330_p5 = scmp.ne.s32.totalorder %s17_s26, %s1329_s29  ;;  %p1334_p6 = scmp.lt.s32.totalorder %s17_s26, %s17_s26 }
   0xd   :  { %p1335_p7 = scmp.lt.s32.totalorder %s1329_s29, %s1329_s29 }
   0xf   :  { %p1336_p8 = por %p1335_p7, %p1334_p6 }
  0x11   :  { %p1337_p9 = pnand %p1336_p8, %p1330_p5 }
  0x13   :  { %1340 = shalt.err (!%p1337_p9)  }
  0x14   :  { %s1484_s0 = smov [#allocation5]  }
  0x15   :  { %19 = dma.vmem_to_smem %s17_s26, 16, %s1484_s0, [#allocation3] }
  0x16   :  { %1433 = dma.done.wait [#allocation3], 32 }
  0x17   :  { %1434 = vsyncadd [#allocation3], 4294967264 }
  0x18   :  { %21 = sfence }
  0x19   :  { %22 = vsyncpa [#allocation8], 0 }
  0x1a   :  { %24 = vsyncpa [#allocation8 + $0x1], 0 }
  0x1b   :  { %25 = vsyncpa [#allocation10], 0 }
  0x1c   :  { %27 = vsyncpa [#allocation10 + $0x1], 0  ;;  %s1533_s1 = smov 0   ;;  %s1535_s30 = smov 0  }
  0x1d   :  { %s1537_s7 = smov 0   ;;  %s1539_s8 = smov 0  }
  0x1e   :  { %s1541_s9 = smov 0   ;;  %s1543_s10 = smov 0  }
  0x1f   :  { %s1545_s11 = smov 0   ;;  %s1547_s12 = smov 0  }
  0x20   :  { %s1549_s13 = smov 0   ;;  %s1551_s14 = smov 0  }
  0x21 LB: > { %1846 = sst [smem:[#allocation14_spill]] %s1473_s12  ;;  %s1009_s15 = sadd.s32 4294967295, %s1481_s14   ;;  %s1481_s14 = sphi %s1551_s14, %s33_s14   ;;  %s1477_s13 = sphi %s1549_s13, %s1863_s13   ;;  %s1473_s12 = sphi %s1547_s12, %s1855_s12   ;;  %s1469_s11 = sphi %s1545_s11, %s1862_s11   ;;  %s1465_s10 = sphi %s1543_s10, %s1854_s10   ;;  %s1461_s9 = sphi %s1541_s9, %s1861_s9   ;;  %s1457_s8 = sphi %s1539_s8, %s1860_s8   ;;  %s1453_s7 = sphi %s1537_s7, %s1859_s7   ;;  %s1449_s30 = sphi %s1535_s30, %s1858_s30   ;;  %s1445_s1 = sphi %s1533_s1, %s1857_s1  }
  0x22   : > { %s42_s16 = sadd.s32 1, %s1473_s12  ;;  %s45_s17 = sadd.s32 1, %s1477_s13 }
  0x23   : > { %p43_p10 = scmp.ge.s32.totalorder %s42_s16, 2  ;;  %s1011_s18 = sshll.u32 %s1477_s13, 1 }
  0x24   : > { %s1010_s19 = sadd.s32 4294967294, %s1481_s14   ;;  %s50_s20 = sadd.s32 %s1473_s12, %s1011_s18 }
  0x25   : > { %s1865_s16 = smov (%p43_p10, %s42_s16), 0  ;;  %s1867_s17 = smov (!%p43_p10, %s45_s17), %s1477_s13 }
  0x26   : > { %1847 = sst [smem:[#allocation15_spill]] %s1865_s16  ;;  %p67_p11 = scmp.ne.s32.totalorder %s1461_s9, %s1457_s8 }
  0x27   : > { %s51_s21 = sld [smem:[#allocation5 + %s50_s20]]  ;;  %p47_p12 = scmp.ge.s32.totalorder %s1867_s17, 2 }
  0x28   : > { %p68_p13 = scmp.eq.s32.totalorder %s1481_s14, 0  ;;  %s133_s22 = sadd.s32 1, %s1453_s7 }
  0x29   : > { %p143_p0 = scmp.ne.s32.totalorder %s1453_s7, %s1449_s30  ;;  %s1869_s17 = smov (%p47_p12, %s1867_s17), 0 }
  0x2a   : > { %1848 = sst [smem:[#allocation16_spill]] %s1869_s17  ;;  %p1600_p1 = por %p68_p13, %p67_p11 }
  0x2b   : > { %p144_p2 = scmp.eq.s32.totalorder %s1009_s15, 3  ;;  %s1012_s24 = sshll.u32 %s1869_s17, 1 }
  0x2c   : > { %s55_s25 = ssub.s32 %s1477_s13, %s1869_s17  ;;  %s53_s26 = sadd.s32 %s1012_s24, %s1865_s16 }
  0x2d   : > { %p131_p3 = scmp.eq.s32.totalorder %s55_s25, 0  ;;  %s54_s27 = sld [smem:[#allocation5 + %s53_s26]] }
  0x2e   : > { %p1608_p4 = por %p144_p2, %p143_p0  ;;  %p149_p5 = scmp.ne.s32.totalorder %s1449_s30, %s1445_s1 }
  0x2f   : > { %s1613_s29 = scalar_select %p131_p3, %s1453_s7, %s133_s22  }
  0x30   : > { %p150_p6 = scmp.eq.s32.totalorder %s1010_s19, 3  ;;  %s60_s15 = sadd.s32 1, %s1461_s9 }
  0x31   : > { %1851 = sst [smem:[#allocation17_spill]] %s1613_s29  ;;  %p1014_p9 = scmp.ge.s32.totalorder %s1481_s14, 4 }
  0x32   : > { %p1617_p7 = por %p150_p6, %p149_p5 }
  0x33   : > { %s56_s18 = ssub.s32 %s51_s21, %s54_s27  ;;  %195 = sbr.rel (%p1014_p9) target bundleno = 76 (0x4c), region = 20 }
  0x34   : > { %s57_s12 = sor.u32 %s56_s18, %s55_s25 }
  0x35   : > { %p58_p8 = scmp.eq.s32.totalorder %s57_s12, 0 }
  0x37   : > { %s1623_s17 = scalar_select %p58_p8, %s1461_s9, %s60_s15  }
  0x38   : > { %198 = sbr.rel (!%p1600_p1) target bundleno = 76 (0x4c), region = 24  ;;  %s205_s22 = sld [smem:[#allocation5 + %s50_s20]] (%p1600_p1) }
  0x39   : > { %s200_s19 = sand.u32 (%p1600_p1), 1, %s1461_s9   ;;  %s1072_s24 = sshll.u32 (%p1600_p1), %s1477_s13, 5 }
  0x3a   : > { %s1015_s26 = sshll.u32 (%p1600_p1), %s200_s19, 6 }
  0x3b   : > { %s202_s20 = scalar_lea.vmem (%p1600_p1), [#allocation6], %s1015_s26 }
  0x3e   : > { %s208_s16 = sadd.s32 %s1072_s24, %s205_s22 }
  0x3f   : > { %s1019_s29 = sshll.u32 %s208_s16, 2 }
  0x40   : > { %s1633_s12 = scalar_lea.vmem %s1837_s2, %s1019_s29 }
  0x41   : > { %v227_v0 = vld [vmem:[%s1633_s12] sm:$0xf]  ;;  %v229_v1 = vld [vmem:[%s1633_s12 + $0x8] sm:$0xf]  ;;  %v231_v2 = vld [vmem:[%s1633_s12 + $0x10] sm:$0xf] }
  0x42   : > { %228 = vst [vmem:[%s202_s20] sm:$0xf] %v227_v0  ;;  %230 = vst [vmem:[%s202_s20 + $0x4] sm:$0xf] %v229_v1  ;;  %v233_v3 = vld [vmem:[%s1633_s12 + $0x18] sm:$0xf] }
  0x43   : > { %232 = vst [vmem:[%s202_s20 + $0x8] sm:$0xf] %v231_v2  ;;  %v235_v4 = vld [vmem:[%s1633_s12 + $0x20] sm:$0xf]  ;;  %v237_v5 = vld [vmem:[%s1633_s12 + $0x28] sm:$0xf] }
  0x44   : > { %234 = vst [vmem:[%s202_s20 + $0xc] sm:$0xf] %v233_v3  ;;  %236 = vst [vmem:[%s202_s20 + $0x10] sm:$0xf] %v235_v4  ;;  %v239_v6 = vld [vmem:[%s1633_s12 + $0x30] sm:$0xf] }
  0x45   : > { %238 = vst [vmem:[%s202_s20 + $0x14] sm:$0xf] %v237_v5  ;;  %v241_v7 = vld [vmem:[%s1633_s12 + $0x38] sm:$0xf]  ;;  %v243_v8 = vld [vmem:[%s1633_s12 + $0x40] sm:$0xf] }
  0x46   : > { %240 = vst [vmem:[%s202_s20 + $0x18] sm:$0xf] %v239_v6  ;;  %242 = vst [vmem:[%s202_s20 + $0x1c] sm:$0xf] %v241_v7  ;;  %v245_v9 = vld [vmem:[%s1633_s12 + $0x48] sm:$0xf] }
  0x47   : > { %244 = vst [vmem:[%s202_s20 + $0x20] sm:$0xf] %v243_v8  ;;  %v247_v10 = vld [vmem:[%s1633_s12 + $0x50] sm:$0xf]  ;;  %v249_v11 = vld [vmem:[%s1633_s12 + $0x58] sm:$0xf] }
  0x48   : > { %246 = vst [vmem:[%s202_s20 + $0x24] sm:$0xf] %v245_v9  ;;  %248 = vst [vmem:[%s202_s20 + $0x28] sm:$0xf] %v247_v10  ;;  %v251_v12 = vld [vmem:[%s1633_s12 + $0x60] sm:$0xf] }
  0x49   : > { %250 = vst [vmem:[%s202_s20 + $0x2c] sm:$0xf] %v249_v11  ;;  %v253_v13 = vld [vmem:[%s1633_s12 + $0x68] sm:$0xf]  ;;  %v255_v14 = vld [vmem:[%s1633_s12 + $0x70] sm:$0xf] }
  0x4a   : > { %252 = vst [vmem:[%s202_s20 + $0x30] sm:$0xf] %v251_v12  ;;  %254 = vst [vmem:[%s202_s20 + $0x34] sm:$0xf] %v253_v13  ;;  %v257_v15 = vld [vmem:[%s1633_s12 + $0x78] sm:$0xf] }
  0x4b   : > { %256 = vst [vmem:[%s202_s20 + $0x38] sm:$0xf] %v255_v14  ;;  %258 = vst [vmem:[%s202_s20 + $0x3c] sm:$0xf] %v257_v15 }
  0x4c PF: > { %p1020_p10 = scmp.ge.s32.totalorder %s1481_s14, 1  ;;  %p322_p11 = scmp.lt.s32.totalorder %s1481_s14, 5 }
  0x4e   : > { %p323_p12 = pnand %p1020_p10, %p322_p11 }
  0x4f   : > { %s329_s16 = sand.u32 (!%p323_p12), 1, %s1457_s8   ;;  %s1655_s23 = sand.u32 (!%p323_p12), 1, %s1449_s30  }
  0x50   : > { %326 = sbr.rel (%p323_p12) target bundleno = 436 (0x1b4), region = 69  ;;  %s1021_s27 = sshll.u32 (!%p323_p12), %s329_s16, 6 }
  0x51   : > { %s1022_s29 = sshll.u32 (!%p323_p12), %s1655_s23, 6  ;;  %s1023_s18 = sshll.u32 (!%p323_p12), %s1655_s23, 7 }
  0x52   : > { %s1024_s15 = sshll.u32 (!%p323_p12), %s1469_s11, 4  ;;  %s1665_s21 = scalar_lea.vmem (!%p323_p12), [#allocation6], %s1021_s27 }
  0x53   : > { %p369_p13 = scmp.lt.s32.totalorder (!%p323_p12), %s1024_s15, 31  ;;  %s1667_s25 = scalar_lea.vmem (!%p323_p12), [#allocation7], %s1022_s29 }
  0x54   : > { %s1669_s8 = scalar_lea.vmem (!%p323_p12), [#allocation9], %s1023_s18  ;;  %p1026_p0 = scmp.ne.s32.totalorder (!%p323_p12), %s1465_s10, 0 }
  0x55   : > { %s1871_s15 = smov (!%p369_p13, %s1024_s15), 31 }
  0x56   : > { %s1025_s22 = sshll.u32 %s1871_s15, 3  ;;  %380 = sbr.rel (%p1026_p0) target bundleno = 100 (0x64), region = 77 }
  0x57   : > { %s1663_s26 = scalar_lea.vmem %s1839_s4, %s1025_s22 }
  0x5b   : > { %v1485_v16 = vmov 0.0  }
  0x5c   : > { %381 = vst [vmem:[#allocation2 + $0x30] sm:$0xff] %v1485_v16  ;;  %382 = vst [vmem:[#allocation2] sm:$0xff] %v1485_v16 }
  0x5d   : > { %383 = vst [vmem:[#allocation2 + $0x58] sm:$0xff] %v1485_v16  ;;  %384 = vst [vmem:[#allocation2 + $0x18] sm:$0xff] %v1485_v16 }
  0x5e   : > { %385 = vst [vmem:[#allocation2 + $0x50] sm:$0xff] %v1485_v16  ;;  %386 = vst [vmem:[#allocation2 + $0x68] sm:$0xff] %v1485_v16 }
  0x5f   : > { %387 = vst [vmem:[#allocation2 + $0x8] sm:$0xff] %v1485_v16  ;;  %388 = vst [vmem:[#allocation2 + $0x48] sm:$0xff] %v1485_v16 }
  0x60   : > { %389 = vst [vmem:[#allocation2 + $0x40] sm:$0xff] %v1485_v16  ;;  %390 = vst [vmem:[#allocation2 + $0x20] sm:$0xff] %v1485_v16 }
  0x61   : > { %391 = vst [vmem:[#allocation2 + $0x10] sm:$0xff] %v1485_v16  ;;  %392 = vst [vmem:[#allocation2 + $0x38] sm:$0xff] %v1485_v16 }
  0x62   : > { %393 = vst [vmem:[#allocation2 + $0x60] sm:$0xff] %v1485_v16  ;;  %394 = vst [vmem:[#allocation2 + $0x70] sm:$0xff] %v1485_v16 }
  0x63   : > { %395 = vst [vmem:[#allocation2 + $0x78] sm:$0xff] %v1485_v16  ;;  %396 = vst [vmem:[#allocation2 + $0x28] sm:$0xff] %v1485_v16 }
  0x64 PF: > { %s397_s12 = sld [smem:[#allocation4 + %s1469_s11]] }
  0x6a   : > { %p1027_p1 = scmp.ge.s32.totalorder %s1465_s10, %s397_s12 }
  0x6b   : > { %s1028_s20 = sshll.u32 (!%p1027_p1), %s1469_s11, 1 }
  0x6c   : > { %401 = sbr.rel (%p1027_p1) target bundleno = 362 (0x16a), region = 81  ;;  %s403_s16 = sadd.s32 (!%p1027_p1), %s1465_s10, %s1028_s20 }
  0x6d   : > { %s404_s27 = sld [smem:[#allocation5 + %s403_s16]] (!%p1027_p1) }
  0x71   : > { %v1309_v17 = vld [vmem:[%s1665_s21] sm:$0xff]   ;;  %v1311_v27 = vld [vmem:[%s1665_s21 + $0x8] sm:$0xff]   ;;  %v1313_v29 = vld [vmem:[%s1665_s21 + $0x10] sm:$0xff]  }
  0x72   : > { %v1310_v18 = vld [vmem:[%s1665_s21 + $0x20] sm:$0xff]   ;;  %1170 = vmatprep.mubr.bf16.mxu0 %v1309_v17  ;;  %v1312_v28 = vld [vmem:[%s1665_s21 + $0x28] sm:$0xff]   ;;  %v1314_v30 = vld [vmem:[%s1665_s21 + $0x30] sm:$0xff]  }
  0x73   : > { %1178 = vmatprep.mubr.bf16.mxu1 %v1310_v18  ;;  %s1029_s29 = sshll.u32 %s404_s27, 7  ;;  %v1315_v31 = vld [vmem:[%s1665_s21 + $0x18] sm:$0xff]   ;;  %v436_v34 = vld [vmem:[#allocation2 + $0x10] sm:$0xff]  ;;  %v434_v38 = vld [vmem:[#allocation2 + $0x40] sm:$0xff] }
  0x74   : > { %s406_s18 = sshra.s32 %s1029_s29, 3  ;;  %v1316_v32 = vld [vmem:[%s1665_s21 + $0x38] sm:$0xff]   ;;  %v426_v37 = vld [vmem:[#allocation2 + $0x30] sm:$0xff]  ;;  %v427_v49 = vld [vmem:[#allocation2] sm:$0xff] }
  0x75   : > { %s1030_s15 = sshll.u32 %s406_s18, 2  ;;  %v428_v33 = vld [vmem:[#allocation2 + $0x58] sm:$0xff]  ;;  %v435_v50 = vld [vmem:[#allocation2 + $0x20] sm:$0xff]  ;;  %v432_v55 = vld [vmem:[#allocation2 + $0x8] sm:$0xff] }
  0x76   : > { %s1681_s24 = scalar_lea.vmem %s1838_s3, %s1030_s15  ;;  %v429_v43 = vld [vmem:[#allocation2 + $0x18] sm:$0xff]  ;;  %v430_v61 = vld [vmem:[#allocation2 + $0x50] sm:$0xff]  ;;  %v438_v62 = vld [vmem:[#allocation2 + $0x60] sm:$0xff] }
  0x77   : > { %v1301_v19 = vld [vmem:[%s1681_s24 + $0x38] sm:$0xff]   ;;  %v1302_v20 = vld [vmem:[%s1681_s24 + $0x30] sm:$0xff]   ;;  %v1303_v21 = vld [vmem:[%s1681_s24 + $0x28] sm:$0xff]  }
  0x78   : > { %1154 = vmatprep.subr.bf16.mxu0 %v1301_v19  ;;  %1186 = vmatprep.subr.bf16.mxu1 %v1301_v19  ;;  %v1304_v22 = vld [vmem:[%s1681_s24 + $0x20] sm:$0xff]   ;;  %v1305_v23 = vld [vmem:[%s1681_s24 + $0x18] sm:$0xff]   ;;  %v1306_v24 = vld [vmem:[%s1681_s24 + $0x10] sm:$0xff]  }
  0x79   : > { %1155 = vmatpush3.bf16.msra.mxu0 %v1301_v19  ;;  %1194 = vmatpush3.bf16.msra.mxu1 %v1301_v19  ;;  %v1307_v25 = vld [vmem:[%s1681_s24 + $0x8] sm:$0xff]   ;;  %v1308_v26 = vld [vmem:[%s1681_s24] sm:$0xff]   ;;  %v437_v44 = vld [vmem:[#allocation2 + $0x38] sm:$0xff] }
  0x7a   : > { %1156 = vmatprep.subr.bf16.mxu0 %v1302_v20  ;;  %1187 = vmatprep.subr.bf16.mxu1 %v1302_v20  ;;  %v440_v56 = vld [vmem:[#allocation2 + $0x78] sm:$0xff]  ;;  %v433_v3 = vld [vmem:[#allocation2 + $0x48] sm:$0xff]  ;;  %v439_v10 = vld [vmem:[#allocation2 + $0x70] sm:$0xff] }
  0x7b   : > { %v441_v4 = vld [vmem:[#allocation2 + $0x28] sm:$0xff] }
  0x7c   : > { %v431_v9 = vld [vmem:[#allocation2 + $0x68] sm:$0xff] }
  0x7d   : > { %1157 = vmatpush3.bf16.msra.mxu0 %v1302_v20  ;;  %1195 = vmatpush3.bf16.msra.mxu1 %v1302_v20 }
  0x7e   : > { %1158 = vmatprep.subr.bf16.mxu0 %v1303_v21  ;;  %1188 = vmatprep.subr.bf16.mxu1 %v1303_v21 }
  0x81   : > { %1159 = vmatpush3.bf16.msra.mxu0 %v1303_v21  ;;  %1196 = vmatpush3.bf16.msra.mxu1 %v1303_v21 }
  0x82   : > { %1160 = vmatprep.subr.bf16.mxu0 %v1304_v22  ;;  %1189 = vmatprep.subr.bf16.mxu1 %v1304_v22 }
  0x85   : > { %1161 = vmatpush3.bf16.msra.mxu0 %v1304_v22  ;;  %1197 = vmatpush3.bf16.msra.mxu1 %v1304_v22 }
  0x86   : > { %1162 = vmatprep.subr.bf16.mxu0 %v1305_v23  ;;  %1190 = vmatprep.subr.bf16.mxu1 %v1305_v23 }
  0x89   : > { %1163 = vmatpush3.bf16.msra.mxu0 %v1305_v23  ;;  %1198 = vmatpush3.bf16.msra.mxu1 %v1305_v23 }
  0x8a   : > { %1164 = vmatprep.subr.bf16.mxu0 %v1306_v24  ;;  %1191 = vmatprep.subr.bf16.mxu1 %v1306_v24 }
  0x8d   : > { %1165 = vmatpush3.bf16.msra.mxu0 %v1306_v24  ;;  %1199 = vmatpush3.bf16.msra.mxu1 %v1306_v24 }
  0x8e   : > { %1166 = vmatprep.subr.bf16.mxu0 %v1307_v25  ;;  %1192 = vmatprep.subr.bf16.mxu1 %v1307_v25 }
  0x91   : > { %1167 = vmatpush3.bf16.msra.mxu0 %v1307_v25  ;;  %1200 = vmatpush3.bf16.msra.mxu1 %v1307_v25 }
  0x92   : > { %1168 = vmatprep.subr.bf16.mxu0 %v1308_v26  ;;  %1193 = vmatprep.subr.bf16.mxu1 %v1308_v26 }
  0x95   : > { %1169 = vmatpush3.bf16.msra.mxu0 %v1308_v26  ;;  %1201 = vmatpush3.bf16.msra.mxu1 %v1308_v26 }
  0x98   : > { %1171 = vmatmul.mubr.bf16.vlgmr.msra.gmra.mxu0 %v1311_v27  ;;  %1179 = vmatmul.mubr.bf16.vlgmr.msra.gmra.mxu1 %v1312_v28 }
  0x99   : > { %1174 = vmatprep.mubr.bf16.mxu0 %v1313_v29  ;;  %1182 = vmatprep.mubr.bf16.mxu1 %v1314_v30 }
  0xa0   : > { %1175 = vmatmul.mubr.bf16.gmra.mxu0 %v1315_v31  ;;  %1183 = vmatmul.mubr.bf16.gmra.mxu1 %v1316_v32 }
 0x158   : > { %v1172_v35 = vpop.f32.mrf.mxu0  ;;  %v1180_v36 = vpop.f32.mrf.mxu1 }
 0x159   : > { %v653_v39 = vadd.f32 %v1172_v35, %v428_v33  ;;  %v661_v40 = vadd.f32 %v1180_v36, %v436_v34 }
 0x15a   : > { %v588_v41 = vpop.f32.mrf.mxu0  ;;  %v620_v42 = vpop.f32.mrf.mxu1 }
 0x15b   : > { %669 = vst [vmem:[#allocation2 + $0x58] sm:$0xff] %v653_v39  ;;  %677 = vst [vmem:[#allocation2 + $0x10] sm:$0xff] %v661_v40  ;;  %v651_v45 = vadd.f32 %v588_v41, %v426_v37  ;;  %v659_v46 = vadd.f32 %v620_v42, %v434_v38 }
 0x15c   : > { %v1173_v47 = vpop.f32.mrf.mxu0  ;;  %v1181_v48 = vpop.f32.mrf.mxu1 }
 0x15d   : > { %667 = vst [vmem:[#allocation2 + $0x30] sm:$0xff] %v651_v45  ;;  %675 = vst [vmem:[#allocation2 + $0x40] sm:$0xff] %v659_v46  ;;  %v654_v51 = vadd.f32 %v1173_v47, %v429_v43  ;;  %v662_v52 = vadd.f32 %v1181_v48, %v437_v44 }
 0x15e   : > { %v591_v53 = vpop.f32.mrf.mxu0  ;;  %v623_v54 = vpop.f32.mrf.mxu1 }
 0x15f   : > { %670 = vst [vmem:[#allocation2 + $0x18] sm:$0xff] %v654_v51  ;;  %678 = vst [vmem:[#allocation2 + $0x38] sm:$0xff] %v662_v52  ;;  %v652_v57 = vadd.f32 %v591_v53, %v427_v49  ;;  %v660_v58 = vadd.f32 %v623_v54, %v435_v50 }
 0x160   : > { %v1176_v59 = vpop.f32.mrf.mxu0  ;;  %v1184_v60 = vpop.f32.mrf.mxu1 }
 0x161   : > { %668 = vst [vmem:[#allocation2] sm:$0xff] %v652_v57  ;;  %676 = vst [vmem:[#allocation2 + $0x20] sm:$0xff] %v660_v58  ;;  %v657_v63 = vadd.f32 %v1176_v59, %v432_v55  ;;  %v665_v0 = vadd.f32 %v1184_v60, %v440_v56 }
 0x162   : > { %v604_v1 = vpop.f32.mrf.mxu0  ;;  %v636_v2 = vpop.f32.mrf.mxu1 }
 0x163   : > { %673 = vst [vmem:[#allocation2 + $0x8] sm:$0xff] %v657_v63  ;;  %681 = vst [vmem:[#allocation2 + $0x78] sm:$0xff] %v665_v0  ;;  %v655_v5 = vadd.f32 %v604_v1, %v430_v61  ;;  %v663_v6 = vadd.f32 %v636_v2, %v438_v62 }
 0x164   : > { %v1177_v7 = vpop.f32.mrf.mxu0  ;;  %v1185_v8 = vpop.f32.mrf.mxu1 }
 0x165   : > { %671 = vst [vmem:[#allocation2 + $0x50] sm:$0xff] %v655_v5  ;;  %679 = vst [vmem:[#allocation2 + $0x60] sm:$0xff] %v663_v6  ;;  %v658_v11 = vadd.f32 %v1177_v7, %v433_v3  ;;  %v666_v12 = vadd.f32 %v1185_v8, %v441_v4 }
 0x166   : > { %v607_v13 = vpop.f32.mrf.mxu0  ;;  %v639_v14 = vpop.f32.mrf.mxu1 }
 0x167   : > { %674 = vst [vmem:[#allocation2 + $0x48] sm:$0xff] %v658_v11  ;;  %682 = vst [vmem:[#allocation2 + $0x28] sm:$0xff] %v666_v12  ;;  %v656_v15 = vadd.f32 %v607_v13, %v431_v9  ;;  %v664_v16 = vadd.f32 %v639_v14, %v439_v10 }
 0x169   : > { %672 = vst [vmem:[#allocation2 + $0x68] sm:$0xff] %v656_v15  ;;  %680 = vst [vmem:[#allocation2 + $0x70] sm:$0xff] %v664_v16 }
 0x16a PF: > { %p1047_p2 = scmp.ne.s32.totalorder %s1465_s10, 1 }
 0x16c   : > { %686 = sbr.rel (%p1047_p2) target bundleno = 388 (0x184), region = 85 }
 0x171   : > { %v687_v17 = vld [vmem:[#allocation2 + $0x30] sm:$0xff]  ;;  %v688_v18 = vld [vmem:[#allocation2] sm:$0xff]  ;;  %v689_v19 = vld [vmem:[#allocation2 + $0x58] sm:$0xff] }
 0x172   : > { %v1094_v20 = vpack.c.bf16 %v688_v18, %v687_v17  ;;  %v690_v21 = vld [vmem:[#allocation2 + $0x18] sm:$0xff]  ;;  %v691_v22 = vld [vmem:[#allocation2 + $0x50] sm:$0xff]  ;;  %v692_v23 = vld [vmem:[#allocation2 + $0x68] sm:$0xff]  ;;  %v799_v24 = vmul.f32 0.33333334, %v687_v17 }
 0x173   : > { %v1099_v25 = vpack.c.bf16 %v690_v21, %v689_v19  ;;  %v1104_v26 = vpack.c.bf16 %v692_v23, %v691_v22  ;;  %v693_v27 = vld [vmem:[#allocation2 + $0x8] sm:$0xff]  ;;  %v695_v29 = vld [vmem:[#allocation2 + $0x40] sm:$0xff]  ;;  %v800_v30 = vmul.f32 0.33333334, %v688_v18  ;;  %v697_v33 = vld [vmem:[#allocation2 + $0x10] sm:$0xff] }
 0x174   : > { %v694_v28 = vld [vmem:[#allocation2 + $0x48] sm:$0xff]  ;;  %1095 = vst [vmem:[%s1667_s25] sm:$0xff] %v1094_v20   ;;  %v696_v32 = vld [vmem:[#allocation2 + $0x20] sm:$0xff]  ;;  %v698_v34 = vld [vmem:[#allocation2 + $0x38] sm:$0xff]  ;;  %v801_v35 = vmul.f32 0.33333334, %v689_v19 }
 0x175   : > { %v1109_v31 = vpack.c.bf16 %v694_v28, %v693_v27  ;;  %1131 = vst [vmem:[%s1667_s25 + $0x8] sm:$0xff] %v1099_v25   ;;  %1132 = vst [vmem:[%s1667_s25 + $0x10] sm:$0xff] %v1104_v26   ;;  %v1114_v36 = vpack.c.bf16 %v696_v32, %v695_v29  ;;  %v1119_v37 = vpack.c.bf16 %v698_v34, %v697_v33  ;;  %v699_v38 = vld [vmem:[#allocation2 + $0x60] sm:$0xff]  ;;  %v700_v39 = vld [vmem:[#allocation2 + $0x70] sm:$0xff]  ;;  %v802_v41 = vmul.f32 0.33333334, %v690_v21 }
 0x176   : > { %v701_v40 = vld [vmem:[#allocation2 + $0x78] sm:$0xff]  ;;  %v1124_v42 = vpack.c.bf16 %v700_v39, %v699_v38  ;;  %v702_v43 = vld [vmem:[#allocation2 + $0x28] sm:$0xff]  ;;  %v783_v44 = vld [vmem:[%s1663_s26] sm:$0xff]  ;;  %v803_v46 = vmul.f32 0.33333334, %v691_v22 }
 0x177   : > { %1133 = vst [vmem:[%s1667_s25 + $0x18] sm:$0xff] %v1109_v31   ;;  %v784_v45 = vld [vmem:[%s1663_s26 + $0x8] sm:$0xff]  ;;  %1134 = vst [vmem:[%s1667_s25 + $0x20] sm:$0xff] %v1114_v36   ;;  %v1129_v47 = vpack.c.bf16 %v702_v43, %v701_v40  ;;  %v815_v48 = vadd.f32 %v799_v24, %v783_v44  ;;  %v785_v50 = vld [vmem:[%s1663_s26 + $0x10] sm:$0xff]  ;;  %v804_v53 = vmul.f32 0.33333334, %v692_v23 }
 0x178   : > { %1135 = vst [vmem:[%s1667_s25 + $0x28] sm:$0xff] %v1119_v37   ;;  %v816_v49 = vadd.f32 %v800_v30, %v784_v45  ;;  %v786_v51 = vld [vmem:[%s1663_s26 + $0x18] sm:$0xff]  ;;  %v787_v52 = vld [vmem:[%s1663_s26 + $0x20] sm:$0xff]  ;;  %1136 = vst [vmem:[%s1667_s25 + $0x30] sm:$0xff] %v1124_v42   ;;  %v817_v54 = vadd.f32 %v801_v35, %v785_v50  ;;  %v805_v59 = vmul.f32 0.33333334, %v693_v27 }
 0x179   : > { %v818_v55 = vadd.f32 %v802_v41, %v786_v51  ;;  %v819_v56 = vadd.f32 %v803_v46, %v787_v52  ;;  %v788_v57 = vld [vmem:[%s1663_s26 + $0x28] sm:$0xff]  ;;  %v789_v58 = vld [vmem:[%s1663_s26 + $0x30] sm:$0xff]  ;;  %v790_v60 = vld [vmem:[%s1663_s26 + $0x38] sm:$0xff]  ;;  %1137 = vst [vmem:[%s1667_s25 + $0x38] sm:$0xff] %v1129_v47   ;;  %v806_v62 = vmul.f32 0.33333334, %v694_v28 }
 0x17a   : > { %831 = vst [vmem:[%s1669_s8] sm:$0xff] %v815_v48  ;;  %832 = vst [vmem:[%s1669_s8 + $0x8] sm:$0xff] %v816_v49  ;;  %v820_v61 = vadd.f32 %v804_v53, %v788_v57  ;;  %v791_v63 = vld [vmem:[%s1663_s26 + $0x40] sm:$0xff]  ;;  %v807_v0 = vmul.f32 0.33333334, %v695_v29  ;;  %v792_v1 = vld [vmem:[%s1663_s26 + $0x48] sm:$0xff]  ;;  %v821_v2 = vadd.f32 %v805_v59, %v789_v58 }
 0x17b   : > { %833 = vst [vmem:[%s1669_s8 + $0x10] sm:$0xff] %v817_v54  ;;  %834 = vst [vmem:[%s1669_s8 + $0x18] sm:$0xff] %v818_v55  ;;  %v808_v3 = vmul.f32 0.33333334, %v696_v32  ;;  %v793_v4 = vld [vmem:[%s1663_s26 + $0x50] sm:$0xff]  ;;  %v794_v6 = vld [vmem:[%s1663_s26 + $0x58] sm:$0xff]  ;;  %v822_v7 = vadd.f32 %v806_v62, %v790_v60 }
 0x17c   : > { %835 = vst [vmem:[%s1669_s8 + $0x20] sm:$0xff] %v819_v56  ;;  %v809_v5 = vmul.f32 0.33333334, %v697_v33  ;;  %836 = vst [vmem:[%s1669_s8 + $0x28] sm:$0xff] %v820_v61  ;;  %v823_v8 = vadd.f32 %v807_v0, %v791_v63  ;;  %v810_v9 = vmul.f32 0.33333334, %v698_v34 }
 0x17d   : > { %v795_v10 = vld [vmem:[%s1663_s26 + $0x60] sm:$0xff]  ;;  %v811_v11 = vmul.f32 0.33333334, %v699_v38  ;;  %v796_v12 = vld [vmem:[%s1663_s26 + $0x68] sm:$0xff]  ;;  %837 = vst [vmem:[%s1669_s8 + $0x30] sm:$0xff] %v821_v2  ;;  %v824_v13 = vadd.f32 %v808_v3, %v792_v1  ;;  %v797_v16 = vld [vmem:[%s1663_s26 + $0x70] sm:$0xff] }
 0x17e   : > { %v825_v14 = vadd.f32 %v809_v5, %v793_v4  ;;  %v812_v15 = vmul.f32 0.33333334, %v700_v39  ;;  %v813_v17 = vmul.f32 0.33333334, %v701_v40  ;;  %v798_v18 = vld [vmem:[%s1663_s26 + $0x78] sm:$0xff]  ;;  %838 = vst [vmem:[%s1669_s8 + $0x38] sm:$0xff] %v822_v7  ;;  %v826_v19 = vadd.f32 %v810_v9, %v794_v6 }
 0x17f   : > { %839 = vst [vmem:[%s1669_s8 + $0x40] sm:$0xff] %v823_v8  ;;  %v827_v20 = vadd.f32 %v811_v11, %v795_v10  ;;  %v814_v21 = vmul.f32 0.33333334, %v702_v43  ;;  %840 = vst [vmem:[%s1669_s8 + $0x48] sm:$0xff] %v824_v13 }
 0x180   : > { %841 = vst [vmem:[%s1669_s8 + $0x50] sm:$0xff] %v825_v14  ;;  %v828_v22 = vadd.f32 %v812_v15, %v796_v12  ;;  %v829_v23 = vadd.f32 %v813_v17, %v797_v16  ;;  %842 = vst [vmem:[%s1669_s8 + $0x58] sm:$0xff] %v826_v19 }
 0x181   : > { %843 = vst [vmem:[%s1669_s8 + $0x60] sm:$0xff] %v827_v20  ;;  %v830_v24 = vadd.f32 %v814_v21, %v798_v18 }
 0x182   : > { %844 = vst [vmem:[%s1669_s8 + $0x68] sm:$0xff] %v828_v22  ;;  %845 = vst [vmem:[%s1669_s8 + $0x70] sm:$0xff] %v829_v23 }
 0x183   : > { %846 = vst [vmem:[%s1669_s8 + $0x78] sm:$0xff] %v830_v24 }
 0x184 PF: > { %s1089_s10 = sshll.u32 %s1469_s11, 10  ;;  %s866_s20 = sshll.u32 %s1667_s25, 4  ;;  %s1745_s20 = int_to_ptr.vmem [resolvable:$true] %s866_s20 }
 0x185   : > { %s1742_s12 = scalar_lea.hbm %s1840_s5, %s1089_s10  ;;  %s848_s16 = scalar_lea.sflag [#allocation8], %s1655_s23 }
 0x186   : > { %s1341_s27 = scalar_lea.vmem %s1745_s20, 1024  ;;  %s1486_s29 = smov [#allocation7]  }
 0x187   : > { %p1342_p3 = scmp.ne.s32.totalorder %s1745_s20, %s1341_s27  ;;  %s1345_s18 = sshll.u32 %s1486_s29, 4  ;;  %s1346_s18 = int_to_ptr.vmem [resolvable:$false] %s1345_s18 }
 0x188   : > { %s1347_s15 = scalar_lea.vmem %s1346_s18, 2048  ;;  %p1348_p8 = scmp.lt.s32.totalorder %s1745_s20, %s1346_s18 }
 0x189   : > { %p1343_p5 = pnand %p1342_p3, %p1608_p4  ;;  %p1349_p9 = scmp.lt.s32.totalorder %s1347_s15, %s1341_s27 }
 0x18b   : > { %p1344_p6 = pneg %p1343_p5  ;;  %p1350_p10 = por %p1349_p9, %p1348_p8 }
 0x18d   : > { %p1351_p11 = pnand %p1350_p10, %p1344_p6 }
 0x18f   : > { %1354 = shalt.err (!%p1351_p11)
}
 0x190   : > { %s1355_s25 = scalar_lea.hbm %s1742_s12, 1024  ;;  %s1359_s24 = scalar_lea.hbm %s1840_s5, 2048 }
 0x191   : > { %p1356_p12 = scmp.ne.s32.totalorder %s1742_s12, %s1355_s25  ;;  %p1360_p1 = scmp.lt.s32.totalorder %s1742_s12, %s1840_s5 }
 0x192   : > { %p1361_p2 = scmp.lt.s32.totalorder %s1359_s24, %s1355_s25 }
 0x193   : > { %p1357_p13 = pnand %p1356_p12, %p1608_p4 }
 0x194   : > { %p1362_p3 = por %p1361_p2, %p1360_p1 }
 0x195   : > { %p1358_p0 = pneg %p1357_p13 }
 0x197   : > { %p1363_p5 = pnand %p1362_p3, %p1358_p0 }
 0x199   : > { %1366 = shalt.err (!%p1363_p5)
}
 0x19a   : > { %s1487_s21 = smov 64   ;;  %s1488_s27 = smov 4  }
 0x19b   : > { %1202 = dma.vmem_to_hbm [thread:$0]  (%p1608_p4), %s1745_s20, 1024, %s1742_s12, %s848_s16, %s1487_s21, %s1487_s21, %s1488_s27  }
 0x19c   : > { %s1090_s29 = sshll.u32 %s1469_s11, 11  ;;  %s882_s18 = sshll.u32 %s1669_s8, 4  ;;  %s1777_s18 = int_to_ptr.vmem [resolvable:$true] %s882_s18 }
 0x19d   : > { %s1775_s22 = scalar_lea.hbm %s1841_s6, %s1090_s29  ;;  %s853_s19 = scalar_lea.sflag [#allocation10], %s1655_s23 }
 0x19e   : > { %s1367_s24 = scalar_lea.vmem %s1777_s18, 2048  ;;  %s1489_s10 = smov [#allocation9]  }
 0x19f   : > { %p1368_p6 = scmp.ne.s32.totalorder %s1777_s18, %s1367_s24  ;;  %s1371_s12 = sshll.u32 %s1489_s10, 4  ;;  %s1372_s12 = int_to_ptr.vmem [resolvable:$false] %s1371_s12 }
 0x1a0   : > { %s1373_s11 = scalar_lea.vmem %s1372_s12, 4096  ;;  %p1374_p10 = scmp.lt.s32.totalorder %s1777_s18, %s1372_s12 }
 0x1a1   : > { %p1369_p8 = pnand %p1368_p6, %p1608_p4  ;;  %p1375_p11 = scmp.lt.s32.totalorder %s1373_s11, %s1367_s24 }
 0x1a3   : > { %p1370_p9 = pneg %p1369_p8  ;;  %p1376_p12 = por %p1375_p11, %p1374_p10 }
 0x1a5   : > { %p1377_p13 = pnand %p1376_p12, %p1370_p9 }
 0x1a7   : > { %1380 = shalt.err (!%p1377_p13)
}
 0x1a8   : > { %s1381_s8 = scalar_lea.hbm %s1775_s22, 2048  ;;  %s1385_s26 = scalar_lea.hbm %s1841_s6, 4096 }
 0x1a9   : > { %p1382_p0 = scmp.ne.s32.totalorder %s1775_s22, %s1381_s8  ;;  %p1386_p3 = scmp.lt.s32.totalorder %s1775_s22, %s1841_s6 }
 0x1aa   : > { %p1387_p5 = scmp.lt.s32.totalorder %s1385_s26, %s1381_s8 }
 0x1ab   : > { %p1383_p1 = pnand %p1382_p0, %p1608_p4 }
 0x1ac   : > { %p1388_p6 = por %p1387_p5, %p1386_p3 }
 0x1ad   : > { %p1384_p2 = pneg %p1383_p1 }
 0x1af   : > { %p1389_p8 = pnand %p1388_p6, %p1384_p2 }
 0x1b1   : > { %1392 = shalt.err (!%p1389_p8)
}
 0x1b2   : > { %s1490_s29 = smov 128   ;;  %s1491_s15 = smov 8  }
 0x1b3   : > { %1203 = dma.vmem_to_hbm [thread:$0]  (%p1608_p4), %s1777_s18, 2048, %s1775_s22, %s853_s19, %s1490_s29, %s1490_s29, %s1491_s15  }
 0x1b4 PF: > { %p1213_p9 = scmp.ge.s32.totalorder %s1481_s14, 2  ;;  %s897_s25 = sand.u32 1, %s1445_s1  }
 0x1b5   : > { %s898_s24 = scalar_lea.sflag [#allocation8], %s897_s25 }
 0x1b6   : > { %p1207_p10 = pnand %p1213_p9, %p1617_p7 }
 0x1b8   : > { %p1208_p11 = pneg %p1207_p10 }
 0x1ba   : > { %1436 = dma.done.wait (%p1208_p11), %s898_s24, 1024  }
 0x1bb   : > { %1438 = vsyncadd (%p1208_p11), %s898_s24, 4294966272  ;;  %s907_s10 = scalar_lea.sflag [#allocation10], %s897_s25 }
 0x1bc   : > { %1440 = dma.done.wait (%p1208_p11), %s907_s10, 2048  }
 0x1bd   : > { %1442 = vsyncadd (%p1208_p11), %s907_s10, 4294965248  ;;  %s33_s14 = sadd.s32 1, %s1481_s14   ;;  %s1853_s28 = sld [smem:[#allocation17_spill]] }
 0x1be   : > { %p30_p12 = scmp.ge.s32.totalorder %s33_s14, 6   ;;  %s1854_s10 = sld [smem:[#allocation14_spill]] }
 0x1bf   : > { %s1855_s12 = sld [smem:[#allocation15_spill]]  ;;  %s1857_s1 = smov %s1449_s30 }
 0x1c0   : > { %s1856_s0 = sld [smem:[#allocation16_spill]]  ;;  %s1858_s30 = smov %s1453_s7 }
 0x1c1   : > { %s1860_s8 = smov %s1461_s9  ;;  %s1861_s9 = smov %s1623_s17 }
 0x1c2   : > { %s1862_s11 = smov %s1477_s13  ;;  %32 = sbr.rel (!%p30_p12) target bundleno = 33 (0x21), region = 146 }
 0x1c3   : > { %s1859_s7 = smov %s1853_s28 }
 0x1c6   : > { %s1863_s13 = smov %s1856_s0 }
 0x1c7   :  { %912 = vsyncpa [#allocation8], 1 }
 0x1c8   :  { %914 = vsyncpa [#allocation8 + $0x1], 1 }
 0x1c9   :  { %915 = vsyncpa [#allocation10], 1 }
 0x1ca   :  { %917 = vsyncpa [#allocation10 + $0x1], 1 }

// kernel: run.3
= control target key start
LH: loop header
LB: loop body
LE: loop exit
PB: predicated region body
PF: predicated region fallthrough
CT: control target
= control target key end

     0   :  { %s1551_s0 = inlined_call_operand.vmem [shape: s32[2], index: 0, kind: input, shape index: {}]   ;;  %s1552_s2 = inlined_call_operand.vmem [shape: bf16[256,256], index: 2, kind: input, shape index: {}]   ;;  %s1553_s3 = inlined_call_operand.vmem [shape: bf16[256,128], index: 3, kind: input, shape index: {}]   ;;  %s1554_s4 = inlined_call_operand.vmem [shape: f32[256,128], index: 4, kind: input, shape index: {}]   ;;  %s1555_s5 = inlined_call_operand.vmem [shape: bf16[256,128], index: 5, kind: output, shape index: {0}]   ;;  %s1556_s6 = inlined_call_operand.vmem [shape: f32[256,128], index: 6, kind: output, shape index: {1}]   ;;  %s1557_s1 = inlined_call_operand.vmem [shape: s32[4], index: 1, kind: input, shape index: {}]  }
   0x1   :  { %s12_s23 = sshll.u32 %s1551_s0, 4  ;;  %s16_s26 = sshll.u32 %s1557_s1, 4  ;;  %s13_s23 = int_to_ptr.vmem [resolvable:$true] %s12_s23  ;;  %s17_s26 = int_to_ptr.vmem [resolvable:$true] %s16_s26 }
   0x2   :  { %s1237_s27 = scalar_lea.vmem %s13_s23, 16  ;;  %p1242_p1 = scmp.lt.s32.totalorder %s13_s23, %s13_s23 }
   0x3   :  { %p1238_p0 = scmp.ne.s32.totalorder %s13_s23, %s1237_s27  ;;  %p1243_p2 = scmp.lt.s32.totalorder %s1237_s27, %s1237_s27 }
   0x5   :  { %p1244_p3 = por %p1243_p2, %p1242_p1 }
   0x7   :  { %p1245_p4 = pnand %p1244_p3, %p1238_p0 }
   0x9   :  { %1248 = shalt.err (!%p1245_p4)  }
   0xa   :  { %s1319_s28 = smov [#allocation4]   ;;  %s1249_s29 = scalar_lea.vmem %s17_s26, 16 }
   0xb   :  { %15 = dma.vmem_to_smem %s13_s23, 16, %s1319_s28, [#allocation3] }
   0xc   :  { %p1250_p5 = scmp.ne.s32.totalorder %s17_s26, %s1249_s29  ;;  %p1254_p6 = scmp.lt.s32.totalorder %s17_s26, %s17_s26 }
   0xd   :  { %p1255_p7 = scmp.lt.s32.totalorder %s1249_s29, %s1249_s29 }
   0xf   :  { %p1256_p8 = por %p1255_p7, %p1254_p6 }
  0x11   :  { %p1257_p9 = pnand %p1256_p8, %p1250_p5 }
  0x13   :  { %1260 = shalt.err (!%p1257_p9)  }
  0x14   :  { %s1320_s0 = smov [#allocation5]  }
  0x15   :  { %19 = dma.vmem_to_smem %s17_s26, 16, %s1320_s0, [#allocation3] }
  0x16   :  { %1289 = dma.done.wait [#allocation3], 32 }
  0x17   :  { %1290 = vsyncadd [#allocation3], 4294967264 }
  0x18   :  { %21 = sfence }
  0x19   :  { %s1363_s1 = smov 0   ;;  %s1365_s30 = smov 0  }
  0x1a   :  { %s1367_s7 = smov 0   ;;  %s1369_s8 = smov 0  }
  0x1b   :  { %s1371_s9 = smov 0   ;;  %s1373_s10 = smov 0  }
  0x1c   :  { %s1375_s11 = smov 0  }
  0x1d LB: > { %s36_s12 = sadd.s32 1, %s1309_s9  ;;  %s39_s13 = sadd.s32 1, %s1313_s10  ;;  %s1317_s11 = sphi %s1375_s11, %s27_s11   ;;  %s1313_s10 = sphi %s1373_s10, %s1563_s10   ;;  %s1309_s9 = sphi %s1371_s9, %s1562_s9   ;;  %s1305_s8 = sphi %s1369_s8, %s1561_s8   ;;  %s1301_s7 = sphi %s1367_s7, %s1560_s7   ;;  %s1297_s30 = sphi %s1365_s30, %s1559_s30   ;;  %s1293_s1 = sphi %s1363_s1, %s1558_s1  }
  0x1e   : > { %p37_p10 = scmp.ge.s32.totalorder %s36_s12, 2  ;;  %s977_s14 = sshll.u32 %s1313_s10, 1 }
  0x1f   : > { %s44_s15 = sadd.s32 %s1309_s9, %s977_s14  ;;  %p61_p11 = scmp.ne.s32.totalorder %s1297_s30, %s1293_s1 }
  0x20   : > { %s1565_s13 = smov (!%p37_p10, %s39_s13), %s1313_s10  ;;  %p62_p13 = scmp.eq.s32.totalorder %s1317_s11, 0 }
  0x21   : > { %p41_p12 = scmp.ge.s32.totalorder %s1565_s13, 2  ;;  %s1567_s12 = smov (%p37_p10, %s36_s12), 0 }
  0x22   : > { %p63_p0 = por %p62_p13, %p61_p11  ;;  %s45_s16 = sld [smem:[#allocation5 + %s44_s15]] }
  0x23   : > { %s1569_s13 = smov (%p41_p12, %s1565_s13), 0  ;;  %s54_s23 = sadd.s32 1, %s1297_s30 }
  0x24   : > { %s978_s17 = sshll.u32 %s1569_s13, 1  ;;  %s49_s20 = ssub.s32 %s1313_s10, %s1569_s13 }
  0x25   : > { %s47_s18 = sadd.s32 %s978_s17, %s1567_s12  ;;  %p980_p2 = scmp.ge.s32.totalorder %s1317_s11, 4 }
  0x26   : > { %s48_s19 = sld [smem:[#allocation5 + %s47_s18]] }
  0x2c   : > { %s50_s21 = ssub.s32 %s45_s16, %s48_s19  ;;  %189 = sbr.rel (%p980_p2) target bundleno = 69 (0x45), region = 20 }
  0x2d   : > { %s51_s22 = sor.u32 %s50_s21, %s49_s20 }
  0x2e   : > { %p52_p1 = scmp.eq.s32.totalorder %s51_s22, 0 }
  0x30   : > { %s1416_s24 = scalar_select %p52_p1, %s1297_s30, %s54_s23  }
  0x31   : > { %192 = sbr.rel (!%p63_p0) target bundleno = 69 (0x45), region = 24  ;;  %s199_s25 = sld [smem:[#allocation5 + %s44_s15]] (%p63_p0) }
  0x32   : > { %s194_s26 = sand.u32 (%p63_p0), 1, %s1297_s30   ;;  %s1034_s27 = sshll.u32 (%p63_p0), %s1313_s10, 5 }
  0x33   : > { %s981_s28 = sshll.u32 (%p63_p0), %s194_s26, 6 }
  0x34   : > { %s196_s15 = scalar_lea.vmem (%p63_p0), [#allocation6], %s981_s28 }
  0x37   : > { %s202_s29 = sadd.s32 %s1034_s27, %s199_s25 }
  0x38   : > { %s985_s0 = sshll.u32 %s202_s29, 2 }
  0x39   : > { %s1424_s16 = scalar_lea.vmem %s1552_s2, %s985_s0 }
  0x3a   : > { %v221_v0 = vld [vmem:[%s1424_s16] sm:$0xf]  ;;  %v223_v1 = vld [vmem:[%s1424_s16 + $0x8] sm:$0xf]  ;;  %v225_v2 = vld [vmem:[%s1424_s16 + $0x10] sm:$0xf] }
  0x3b   : > { %222 = vst [vmem:[%s196_s15] sm:$0xf] %v221_v0  ;;  %224 = vst [vmem:[%s196_s15 + $0x4] sm:$0xf] %v223_v1  ;;  %v227_v3 = vld [vmem:[%s1424_s16 + $0x18] sm:$0xf] }
  0x3c   : > { %226 = vst [vmem:[%s196_s15 + $0x8] sm:$0xf] %v225_v2  ;;  %v229_v4 = vld [vmem:[%s1424_s16 + $0x20] sm:$0xf]  ;;  %v231_v5 = vld [vmem:[%s1424_s16 + $0x28] sm:$0xf] }
  0x3d   : > { %228 = vst [vmem:[%s196_s15 + $0xc] sm:$0xf] %v227_v3  ;;  %230 = vst [vmem:[%s196_s15 + $0x10] sm:$0xf] %v229_v4  ;;  %v233_v6 = vld [vmem:[%s1424_s16 + $0x30] sm:$0xf] }
  0x3e   : > { %232 = vst [vmem:[%s196_s15 + $0x14] sm:$0xf] %v231_v5  ;;  %v235_v7 = vld [vmem:[%s1424_s16 + $0x38] sm:$0xf]  ;;  %v237_v8 = vld [vmem:[%s1424_s16 + $0x40] sm:$0xf] }
  0x3f   : > { %234 = vst [vmem:[%s196_s15 + $0x18] sm:$0xf] %v233_v6  ;;  %236 = vst [vmem:[%s196_s15 + $0x1c] sm:$0xf] %v235_v7  ;;  %v239_v9 = vld [vmem:[%s1424_s16 + $0x48] sm:$0xf] }
  0x40   : > { %238 = vst [vmem:[%s196_s15 + $0x20] sm:$0xf] %v237_v8  ;;  %v241_v10 = vld [vmem:[%s1424_s16 + $0x50] sm:$0xf]  ;;  %v243_v11 = vld [vmem:[%s1424_s16 + $0x58] sm:$0xf] }
  0x41   : > { %240 = vst [vmem:[%s196_s15 + $0x24] sm:$0xf] %v239_v9  ;;  %242 = vst [vmem:[%s196_s15 + $0x28] sm:$0xf] %v241_v10  ;;  %v245_v12 = vld [vmem:[%s1424_s16 + $0x60] sm:$0xf] }
  0x42   : > { %244 = vst [vmem:[%s196_s15 + $0x2c] sm:$0xf] %v243_v11  ;;  %v247_v13 = vld [vmem:[%s1424_s16 + $0x68] sm:$0xf]  ;;  %v249_v14 = vld [vmem:[%s1424_s16 + $0x70] sm:$0xf] }
  0x43   : > { %246 = vst [vmem:[%s196_s15 + $0x30] sm:$0xf] %v245_v12  ;;  %248 = vst [vmem:[%s196_s15 + $0x34] sm:$0xf] %v247_v13  ;;  %v251_v15 = vld [vmem:[%s1424_s16 + $0x78] sm:$0xf] }
  0x44   : > { %250 = vst [vmem:[%s196_s15 + $0x38] sm:$0xf] %v249_v14  ;;  %252 = vst [vmem:[%s196_s15 + $0x3c] sm:$0xf] %v251_v15 }
  0x45 PF: > { %p986_p3 = scmp.ge.s32.totalorder %s1317_s11, 1  ;;  %p316_p4 = scmp.lt.s32.totalorder %s1317_s11, 5 }
  0x47   : > { %p317_p5 = pnand %p986_p3, %p316_p4 }
  0x48   : > { %s323_s18 = sand.u32 (!%p317_p5), 1, %s1293_s1   ;;  %s988_s19 = sshll.u32 (!%p317_p5), %s1305_s8, 4 }
  0x49   : > { %320 = sbr.rel (%p317_p5) target bundleno = 380 (0x17c), region = 69  ;;  %s987_s20 = sshll.u32 (!%p317_p5), %s323_s18, 6 }
  0x4a   : > { %p363_p6 = scmp.lt.s32.totalorder (!%p317_p5), %s988_s19, 31  ;;  %s1461_s17 = scalar_lea.vmem (!%p317_p5), [#allocation6], %s987_s20 }
  0x4b   : > { %p994_p7 = scmp.ne.s32.totalorder (!%p317_p5), %s1301_s7, 0 }
  0x4e   : > { %s1571_s19 = smov (!%p363_p6, %s988_s19), 31  ;;  %384 = sbr.rel (%p994_p7) target bundleno = 92 (0x5c), region = 77 }
  0x4f   : > { %s989_s21 = sshll.u32 %s1571_s19, 3  ;;  %s991_s22 = sshll.u32 %s1571_s19, 2 }
  0x50   : > { %s1449_s26 = scalar_lea.vmem %s1554_s4, %s989_s21  ;;  %s1454_s29 = scalar_lea.vmem %s1555_s5, %s991_s22 }
  0x51   : > { %s1459_s1 = scalar_lea.vmem %s1556_s6, %s989_s21 }
  0x53   : > { %v1321_v16 = vmov 0.0  }
  0x54   : > { %385 = vst [vmem:[#allocation2 + $0x30] sm:$0xff] %v1321_v16  ;;  %386 = vst [vmem:[#allocation2] sm:$0xff] %v1321_v16 }
  0x55   : > { %387 = vst [vmem:[#allocation2 + $0x58] sm:$0xff] %v1321_v16  ;;  %388 = vst [vmem:[#allocation2 + $0x18] sm:$0xff] %v1321_v16 }
  0x56   : > { %389 = vst [vmem:[#allocation2 + $0x50] sm:$0xff] %v1321_v16  ;;  %390 = vst [vmem:[#allocation2 + $0x68] sm:$0xff] %v1321_v16 }
  0x57   : > { %391 = vst [vmem:[#allocation2 + $0x8] sm:$0xff] %v1321_v16  ;;  %392 = vst [vmem:[#allocation2 + $0x48] sm:$0xff] %v1321_v16 }
  0x58   : > { %393 = vst [vmem:[#allocation2 + $0x40] sm:$0xff] %v1321_v16  ;;  %394 = vst [vmem:[#allocation2 + $0x20] sm:$0xff] %v1321_v16 }
  0x59   : > { %395 = vst [vmem:[#allocation2 + $0x10] sm:$0xff] %v1321_v16  ;;  %396 = vst [vmem:[#allocation2 + $0x38] sm:$0xff] %v1321_v16 }
  0x5a   : > { %397 = vst [vmem:[#allocation2 + $0x60] sm:$0xff] %v1321_v16  ;;  %398 = vst [vmem:[#allocation2 + $0x70] sm:$0xff] %v1321_v16 }
  0x5b   : > { %399 = vst [vmem:[#allocation2 + $0x78] sm:$0xff] %v1321_v16  ;;  %400 = vst [vmem:[#allocation2 + $0x28] sm:$0xff] %v1321_v16 }
  0x5c PF: > { %s401_s16 = sld [smem:[#allocation4 + %s1305_s8]] }
  0x62   : > { %p995_p8 = scmp.ge.s32.totalorder %s1301_s7, %s401_s16 }
  0x63   : > { %s996_s15 = sshll.u32 (!%p995_p8), %s1305_s8, 1 }
  0x64   : > { %405 = sbr.rel (%p995_p8) target bundleno = 354 (0x162), region = 81  ;;  %s407_s18 = sadd.s32 (!%p995_p8), %s1301_s7, %s996_s15 }
  0x65   : > { %s408_s19 = sld [smem:[#allocation5 + %s407_s18]] (!%p995_p8) }
  0x69   : > { %v1229_v17 = vld [vmem:[%s1461_s17] sm:$0xff]   ;;  %v1231_v27 = vld [vmem:[%s1461_s17 + $0x8] sm:$0xff]   ;;  %v1233_v29 = vld [vmem:[%s1461_s17 + $0x10] sm:$0xff]  }
  0x6a   : > { %v1230_v18 = vld [vmem:[%s1461_s17 + $0x20] sm:$0xff]   ;;  %1130 = vmatprep.mubr.bf16.mxu0 %v1229_v17  ;;  %v1232_v28 = vld [vmem:[%s1461_s17 + $0x28] sm:$0xff]   ;;  %v1234_v30 = vld [vmem:[%s1461_s17 + $0x30] sm:$0xff]  }
  0x6b   : > { %1138 = vmatprep.mubr.bf16.mxu1 %v1230_v18  ;;  %s997_s20 = sshll.u32 %s408_s19, 7  ;;  %v1235_v31 = vld [vmem:[%s1461_s17 + $0x18] sm:$0xff]   ;;  %v440_v34 = vld [vmem:[#allocation2 + $0x10] sm:$0xff]  ;;  %v438_v38 = vld [vmem:[#allocation2 + $0x40] sm:$0xff] }
  0x6c   : > { %s410_s21 = sshra.s32 %s997_s20, 3  ;;  %v1236_v32 = vld [vmem:[%s1461_s17 + $0x38] sm:$0xff]   ;;  %v430_v37 = vld [vmem:[#allocation2 + $0x30] sm:$0xff]  ;;  %v431_v49 = vld [vmem:[#allocation2] sm:$0xff] }
  0x6d   : > { %s998_s22 = sshll.u32 %s410_s21, 2  ;;  %v432_v33 = vld [vmem:[#allocation2 + $0x58] sm:$0xff]  ;;  %v439_v50 = vld [vmem:[#allocation2 + $0x20] sm:$0xff]  ;;  %v436_v55 = vld [vmem:[#allocation2 + $0x8] sm:$0xff] }
  0x6e   : > { %s1473_s27 = scalar_lea.vmem %s1553_s3, %s998_s22  ;;  %v433_v43 = vld [vmem:[#allocation2 + $0x18] sm:$0xff]  ;;  %v434_v61 = vld [vmem:[#allocation2 + $0x50] sm:$0xff]  ;;  %v442_v62 = vld [vmem:[#allocation2 + $0x60] sm:$0xff] }
  0x6f   : > { %v1221_v19 = vld [vmem:[%s1473_s27 + $0x38] sm:$0xff]   ;;  %v1222_v20 = vld [vmem:[%s1473_s27 + $0x30] sm:$0xff]   ;;  %v1223_v21 = vld [vmem:[%s1473_s27 + $0x28] sm:$0xff]  }
  0x70   : > { %1114 = vmatprep.subr.bf16.mxu0 %v1221_v19  ;;  %1146 = vmatprep.subr.bf16.mxu1 %v1221_v19  ;;  %v1224_v22 = vld [vmem:[%s1473_s27 + $0x20] sm:$0xff]   ;;  %v1225_v23 = vld [vmem:[%s1473_s27 + $0x18] sm:$0xff]   ;;  %v1226_v24 = vld [vmem:[%s1473_s27 + $0x10] sm:$0xff]  }
  0x71   : > { %1115 = vmatpush3.bf16.msra.mxu0 %v1221_v19  ;;  %1154 = vmatpush3.bf16.msra.mxu1 %v1221_v19  ;;  %v1227_v25 = vld [vmem:[%s1473_s27 + $0x8] sm:$0xff]   ;;  %v1228_v26 = vld [vmem:[%s1473_s27] sm:$0xff]   ;;  %v441_v44 = vld [vmem:[#allocation2 + $0x38] sm:$0xff] }
  0x72   : > { %1116 = vmatprep.subr.bf16.mxu0 %v1222_v20  ;;  %1147 = vmatprep.subr.bf16.mxu1 %v1222_v20  ;;  %v444_v56 = vld [vmem:[#allocation2 + $0x78] sm:$0xff]  ;;  %v437_v3 = vld [vmem:[#allocation2 + $0x48] sm:$0xff]  ;;  %v443_v10 = vld [vmem:[#allocation2 + $0x70] sm:$0xff] }
  0x73   : > { %v445_v4 = vld [vmem:[#allocation2 + $0x28] sm:$0xff] }
  0x74   : > { %v435_v9 = vld [vmem:[#allocation2 + $0x68] sm:$0xff] }
  0x75   : > { %1117 = vmatpush3.bf16.msra.mxu0 %v1222_v20  ;;  %1155 = vmatpush3.bf16.msra.mxu1 %v1222_v20 }
  0x76   : > { %1118 = vmatprep.subr.bf16.mxu0 %v1223_v21  ;;  %1148 = vmatprep.subr.bf16.mxu1 %v1223_v21 }
  0x79   : > { %1119 = vmatpush3.bf16.msra.mxu0 %v1223_v21  ;;  %1156 = vmatpush3.bf16.msra.mxu1 %v1223_v21 }
  0x7a   : > { %1120 = vmatprep.subr.bf16.mxu0 %v1224_v22  ;;  %1149 = vmatprep.subr.bf16.mxu1 %v1224_v22 }
  0x7d   : > { %1121 = vmatpush3.bf16.msra.mxu0 %v1224_v22  ;;  %1157 = vmatpush3.bf16.msra.mxu1 %v1224_v22 }
  0x7e   : > { %1122 = vmatprep.subr.bf16.mxu0 %v1225_v23  ;;  %1150 = vmatprep.subr.bf16.mxu1 %v1225_v23 }
  0x81   : > { %1123 = vmatpush3.bf16.msra.mxu0 %v1225_v23  ;;  %1158 = vmatpush3.bf16.msra.mxu1 %v1225_v23 }
  0x82   : > { %1124 = vmatprep.subr.bf16.mxu0 %v1226_v24  ;;  %1151 = vmatprep.subr.bf16.mxu1 %v1226_v24 }
  0x85   : > { %1125 = vmatpush3.bf16.msra.mxu0 %v1226_v24  ;;  %1159 = vmatpush3.bf16.msra.mxu1 %v1226_v24 }
  0x86   : > { %1126 = vmatprep.subr.bf16.mxu0 %v1227_v25  ;;  %1152 = vmatprep.subr.bf16.mxu1 %v1227_v25 }
  0x89   : > { %1127 = vmatpush3.bf16.msra.mxu0 %v1227_v25  ;;  %1160 = vmatpush3.bf16.msra.mxu1 %v1227_v25 }
  0x8a   : > { %1128 = vmatprep.subr.bf16.mxu0 %v1228_v26  ;;  %1153 = vmatprep.subr.bf16.mxu1 %v1228_v26 }
  0x8d   : > { %1129 = vmatpush3.bf16.msra.mxu0 %v1228_v26  ;;  %1161 = vmatpush3.bf16.msra.mxu1 %v1228_v26 }
  0x90   : > { %1131 = vmatmul.mubr.bf16.vlgmr.msra.gmra.mxu0 %v1231_v27  ;;  %1139 = vmatmul.mubr.bf16.vlgmr.msra.gmra.mxu1 %v1232_v28 }
  0x91   : > { %1134 = vmatprep.mubr.bf16.mxu0 %v1233_v29  ;;  %1142 = vmatprep.mubr.bf16.mxu1 %v1234_v30 }
  0x98   : > { %1135 = vmatmul.mubr.bf16.gmra.mxu0 %v1235_v31  ;;  %1143 = vmatmul.mubr.bf16.gmra.mxu1 %v1236_v32 }
 0x150   : > { %v1132_v35 = vpop.f32.mrf.mxu0  ;;  %v1140_v36 = vpop.f32.mrf.mxu1 }
 0x151   : > { %v657_v39 = vadd.f32 %v1132_v35, %v432_v33  ;;  %v665_v40 = vadd.f32 %v1140_v36, %v440_v34 }
 0x152   : > { %v592_v41 = vpop.f32.mrf.mxu0  ;;  %v624_v42 = vpop.f32.mrf.mxu1 }
 0x153   : > { %673 = vst [vmem:[#allocation2 + $0x58] sm:$0xff] %v657_v39  ;;  %681 = vst [vmem:[#allocation2 + $0x10] sm:$0xff] %v665_v40  ;;  %v655_v45 = vadd.f32 %v592_v41, %v430_v37  ;;  %v663_v46 = vadd.f32 %v624_v42, %v438_v38 }
 0x154   : > { %v1133_v47 = vpop.f32.mrf.mxu0  ;;  %v1141_v48 = vpop.f32.mrf.mxu1 }
 0x155   : > { %671 = vst [vmem:[#allocation2 + $0x30] sm:$0xff] %v655_v45  ;;  %679 = vst [vmem:[#allocation2 + $0x40] sm:$0xff] %v663_v46  ;;  %v658_v51 = vadd.f32 %v1133_v47, %v433_v43  ;;  %v666_v52 = vadd.f32 %v1141_v48, %v441_v44 }
 0x156   : > { %v595_v53 = vpop.f32.mrf.mxu0  ;;  %v627_v54 = vpop.f32.mrf.mxu1 }
 0x157   : > { %674 = vst [vmem:[#allocation2 + $0x18] sm:$0xff] %v658_v51  ;;  %682 = vst [vmem:[#allocation2 + $0x38] sm:$0xff] %v666_v52  ;;  %v656_v57 = vadd.f32 %v595_v53, %v431_v49  ;;  %v664_v58 = vadd.f32 %v627_v54, %v439_v50 }
 0x158   : > { %v1136_v59 = vpop.f32.mrf.mxu0  ;;  %v1144_v60 = vpop.f32.mrf.mxu1 }
 0x159   : > { %672 = vst [vmem:[#allocation2] sm:$0xff] %v656_v57  ;;  %680 = vst [vmem:[#allocation2 + $0x20] sm:$0xff] %v664_v58  ;;  %v661_v63 = vadd.f32 %v1136_v59, %v436_v55  ;;  %v669_v0 = vadd.f32 %v1144_v60, %v444_v56 }
 0x15a   : > { %v608_v1 = vpop.f32.mrf.mxu0  ;;  %v640_v2 = vpop.f32.mrf.mxu1 }
 0x15b   : > { %677 = vst [vmem:[#allocation2 + $0x8] sm:$0xff] %v661_v63  ;;  %685 = vst [vmem:[#allocation2 + $0x78] sm:$0xff] %v669_v0  ;;  %v659_v5 = vadd.f32 %v608_v1, %v434_v61  ;;  %v667_v6 = vadd.f32 %v640_v2, %v442_v62 }
 0x15c   : > { %v1137_v7 = vpop.f32.mrf.mxu0  ;;  %v1145_v8 = vpop.f32.mrf.mxu1 }
 0x15d   : > { %675 = vst [vmem:[#allocation2 + $0x50] sm:$0xff] %v659_v5  ;;  %683 = vst [vmem:[#allocation2 + $0x60] sm:$0xff] %v667_v6  ;;  %v662_v11 = vadd.f32 %v1137_v7, %v437_v3  ;;  %v670_v12 = vadd.f32 %v1145_v8, %v445_v4 }
 0x15e   : > { %v611_v13 = vpop.f32.mrf.mxu0  ;;  %v643_v14 = vpop.f32.mrf.mxu1 }
 0x15f   : > { %678 = vst [vmem:[#allocation2 + $0x48] sm:$0xff] %v662_v11  ;;  %686 = vst [vmem:[#allocation2 + $0x28] sm:$0xff] %v670_v12  ;;  %v660_v15 = vadd.f32 %v611_v13, %v435_v9  ;;  %v668_v16 = vadd.f32 %v643_v14, %v443_v10 }
 0x161   : > { %676 = vst [vmem:[#allocation2 + $0x68] sm:$0xff] %v660_v15  ;;  %684 = vst [vmem:[#allocation2 + $0x70] sm:$0xff] %v668_v16 }
 0x162 PF: > { %p1015_p9 = scmp.ne.s32.totalorder %s1301_s7, 1 }
 0x164   : > { %690 = sbr.rel (%p1015_p9) target bundleno = 380 (0x17c), region = 85 }
 0x169   : > { %v691_v17 = vld [vmem:[#allocation2 + $0x30] sm:$0xff]  ;;  %v692_v18 = vld [vmem:[#allocation2] sm:$0xff]  ;;  %v693_v19 = vld [vmem:[#allocation2 + $0x58] sm:$0xff] }
 0x16a   : > { %v1054_v20 = vpack.c.bf16 %v692_v18, %v691_v17  ;;  %v694_v21 = vld [vmem:[#allocation2 + $0x18] sm:$0xff]  ;;  %v695_v22 = vld [vmem:[#allocation2 + $0x50] sm:$0xff]  ;;  %v696_v23 = vld [vmem:[#allocation2 + $0x68] sm:$0xff]  ;;  %v803_v24 = vmul.f32 0.33333334, %v691_v17 }
 0x16b   : > { %v1059_v25 = vpack.c.bf16 %v694_v21, %v693_v19  ;;  %v1064_v26 = vpack.c.bf16 %v696_v23, %v695_v22  ;;  %v697_v27 = vld [vmem:[#allocation2 + $0x8] sm:$0xff]  ;;  %v699_v29 = vld [vmem:[#allocation2 + $0x40] sm:$0xff]  ;;  %v804_v30 = vmul.f32 0.33333334, %v692_v18  ;;  %v701_v33 = vld [vmem:[#allocation2 + $0x10] sm:$0xff] }
 0x16c   : > { %v698_v28 = vld [vmem:[#allocation2 + $0x48] sm:$0xff]  ;;  %1055 = vst [vmem:[%s1454_s29] sm:$0xff] %v1054_v20   ;;  %v700_v32 = vld [vmem:[#allocation2 + $0x20] sm:$0xff]  ;;  %v702_v34 = vld [vmem:[#allocation2 + $0x38] sm:$0xff]  ;;  %v805_v35 = vmul.f32 0.33333334, %v693_v19 }
 0x16d   : > { %v1069_v31 = vpack.c.bf16 %v698_v28, %v697_v27  ;;  %1091 = vst [vmem:[%s1454_s29 + $0x8] sm:$0xff] %v1059_v25   ;;  %1092 = vst [vmem:[%s1454_s29 + $0x10] sm:$0xff] %v1064_v26   ;;  %v1074_v36 = vpack.c.bf16 %v700_v32, %v699_v29  ;;  %v1079_v37 = vpack.c.bf16 %v702_v34, %v701_v33  ;;  %v703_v38 = vld [vmem:[#allocation2 + $0x60] sm:$0xff]  ;;  %v704_v39 = vld [vmem:[#allocation2 + $0x70] sm:$0xff]  ;;  %v806_v41 = vmul.f32 0.33333334, %v694_v21 }
 0x16e   : > { %v705_v40 = vld [vmem:[#allocation2 + $0x78] sm:$0xff]  ;;  %v1084_v42 = vpack.c.bf16 %v704_v39, %v703_v38  ;;  %v706_v43 = vld [vmem:[#allocation2 + $0x28] sm:$0xff]  ;;  %v787_v44 = vld [vmem:[%s1449_s26] sm:$0xff]  ;;  %v807_v46 = vmul.f32 0.33333334, %v695_v22 }
 0x16f   : > { %1093 = vst [vmem:[%s1454_s29 + $0x18] sm:$0xff] %v1069_v31   ;;  %v788_v45 = vld [vmem:[%s1449_s26 + $0x8] sm:$0xff]  ;;  %1094 = vst [vmem:[%s1454_s29 + $0x20] sm:$0xff] %v1074_v36   ;;  %v1089_v47 = vpack.c.bf16 %v706_v43, %v705_v40  ;;  %v819_v48 = vadd.f32 %v803_v24, %v787_v44  ;;  %v789_v50 = vld [vmem:[%s1449_s26 + $0x10] sm:$0xff]  ;;  %v808_v53 = vmul.f32 0.33333334, %v696_v23 }
 0x170   : > { %1095 = vst [vmem:[%s1454_s29 + $0x28] sm:$0xff] %v1079_v37   ;;  %v820_v49 = vadd.f32 %v804_v30, %v788_v45  ;;  %v790_v51 = vld [vmem:[%s1449_s26 + $0x18] sm:$0xff]  ;;  %v791_v52 = vld [vmem:[%s1449_s26 + $0x20] sm:$0xff]  ;;  %1096 = vst [vmem:[%s1454_s29 + $0x30] sm:$0xff] %v1084_v42   ;;  %v821_v54 = vadd.f32 %v805_v35, %v789_v50  ;;  %v809_v59 = vmul.f32 0.33333334, %v697_v27 }
 0x171   : > { %v822_v55 = vadd.f32 %v806_v41, %v790_v51  ;;  %v823_v56 = vadd.f32 %v807_v46, %v791_v52  ;;  %v792_v57 = vld [vmem:[%s1449_s26 + $0x28] sm:$0xff]  ;;  %v793_v58 = vld [vmem:[%s1449_s26 + $0x30] sm:$0xff]  ;;  %v794_v60 = vld [vmem:[%s1449_s26 + $0x38] sm:$0xff]  ;;  %1097 = vst [vmem:[%s1454_s29 + $0x38] sm:$0xff] %v1089_v47   ;;  %v810_v62 = vmul.f32 0.33333334, %v698_v28 }
 0x172   : > { %835 = vst [vmem:[%s1459_s1] sm:$0xff] %v819_v48  ;;  %836 = vst [vmem:[%s1459_s1 + $0x8] sm:$0xff] %v820_v49  ;;  %v824_v61 = vadd.f32 %v808_v53, %v792_v57  ;;  %v795_v63 = vld [vmem:[%s1449_s26 + $0x40] sm:$0xff]  ;;  %v811_v0 = vmul.f32 0.33333334, %v699_v29  ;;  %v796_v1 = vld [vmem:[%s1449_s26 + $0x48] sm:$0xff]  ;;  %v825_v2 = vadd.f32 %v809_v59, %v793_v58 }
 0x173   : > { %837 = vst [vmem:[%s1459_s1 + $0x10] sm:$0xff] %v821_v54  ;;  %838 = vst [vmem:[%s1459_s1 + $0x18] sm:$0xff] %v822_v55  ;;  %v812_v3 = vmul.f32 0.33333334, %v700_v32  ;;  %v797_v4 = vld [vmem:[%s1449_s26 + $0x50] sm:$0xff]  ;;  %v798_v6 = vld [vmem:[%s1449_s26 + $0x58] sm:$0xff]  ;;  %v826_v7 = vadd.f32 %v810_v62, %v794_v60 }
 0x174   : > { %839 = vst [vmem:[%s1459_s1 + $0x20] sm:$0xff] %v823_v56  ;;  %v813_v5 = vmul.f32 0.33333334, %v701_v33  ;;  %840 = vst [vmem:[%s1459_s1 + $0x28] sm:$0xff] %v824_v61  ;;  %v827_v8 = vadd.f32 %v811_v0, %v795_v63  ;;  %v814_v9 = vmul.f32 0.33333334, %v702_v34 }
 0x175   : > { %v799_v10 = vld [vmem:[%s1449_s26 + $0x60] sm:$0xff]  ;;  %v815_v11 = vmul.f32 0.33333334, %v703_v38  ;;  %v800_v12 = vld [vmem:[%s1449_s26 + $0x68] sm:$0xff]  ;;  %841 = vst [vmem:[%s1459_s1 + $0x30] sm:$0xff] %v825_v2  ;;  %v828_v13 = vadd.f32 %v812_v3, %v796_v1  ;;  %v801_v16 = vld [vmem:[%s1449_s26 + $0x70] sm:$0xff] }
 0x176   : > { %v829_v14 = vadd.f32 %v813_v5, %v797_v4  ;;  %v816_v15 = vmul.f32 0.33333334, %v704_v39  ;;  %v817_v17 = vmul.f32 0.33333334, %v705_v40  ;;  %v802_v18 = vld [vmem:[%s1449_s26 + $0x78] sm:$0xff]  ;;  %842 = vst [vmem:[%s1459_s1 + $0x38] sm:$0xff] %v826_v7  ;;  %v830_v19 = vadd.f32 %v814_v9, %v798_v6 }
 0x177   : > { %843 = vst [vmem:[%s1459_s1 + $0x40] sm:$0xff] %v827_v8  ;;  %v831_v20 = vadd.f32 %v815_v11, %v799_v10  ;;  %v818_v21 = vmul.f32 0.33333334, %v706_v43  ;;  %844 = vst [vmem:[%s1459_s1 + $0x48] sm:$0xff] %v828_v13 }
 0x178   : > { %845 = vst [vmem:[%s1459_s1 + $0x50] sm:$0xff] %v829_v14  ;;  %v832_v22 = vadd.f32 %v816_v15, %v800_v12  ;;  %v833_v23 = vadd.f32 %v817_v17, %v801_v16  ;;  %846 = vst [vmem:[%s1459_s1 + $0x58] sm:$0xff] %v830_v19 }
 0x179   : > { %847 = vst [vmem:[%s1459_s1 + $0x60] sm:$0xff] %v831_v20  ;;  %v834_v24 = vadd.f32 %v818_v21, %v802_v18 }
 0x17a   : > { %848 = vst [vmem:[%s1459_s1 + $0x68] sm:$0xff] %v832_v22  ;;  %849 = vst [vmem:[%s1459_s1 + $0x70] sm:$0xff] %v833_v23 }
 0x17b   : > { %850 = vst [vmem:[%s1459_s1 + $0x78] sm:$0xff] %v834_v24 }
 0x17c PF: > { %s27_s11 = sadd.s32 1, %s1317_s11   ;;  %s1558_s1 = smov %s1297_s30 }
 0x17d   : > { %p24_p10 = scmp.ge.s32.totalorder %s27_s11, 6   ;;  %s1559_s30 = smov %s1416_s24 }
 0x17e   : > { %s1560_s7 = smov %s1309_s9  ;;  %s1561_s8 = smov %s1313_s10 }
 0x17f   : > { %s1562_s9 = smov %s1567_s12  ;;  %s1563_s10 = smov %s1569_s13 }
 0x180   :  { %26 = sbr.rel (!%p24_p10) target bundleno = 29 (0x1d), region = 136 }

</bundles_post_ra>
